<compile_context>
chip_gen: v5e
topology: v5e:2x2
jax: 0.10.0
libtpu: 0.0.40
codegen_flags: <defaults>
</compile_context>

<pallas_src>
import functools

import jax
import jax.numpy as jnp
from jax import lax
from jax.experimental import pallas as pl
from jax.experimental.pallas import tpu as pltpu


# --------------------------------------------------------------------------- #
# pass 1: sharpened target probabilities + sinkhorn -> q ; normalized bf16 p
# --------------------------------------------------------------------------- #
def _target_q_kernel(t_ref, p_ref, q_ref, p_bf16_ref, *, temperature,
                     target_sharpen_temperature, sinkhorn_iterations,
                     num_targets, num_prototypes):
    eps2 = 1e-24  # (1e-12)**2 -> matches F.normalize eps applied to ||x||

    t = t_ref[...].astype(jnp.float32)                      # (B, D)
    p = p_ref[...].astype(jnp.float32)                      # (K, D)

    # L2 normalization scales in f32; temperatures folded into the row scale.
    # sharpen(softmax(z/T), Ts) renormalized == softmax(z/(T*Ts)).
    t_scale = lax.rsqrt(jnp.maximum(jnp.sum(t * t, axis=1, keepdims=True), eps2))
    p_scale = lax.rsqrt(jnp.maximum(jnp.sum(p * p, axis=1, keepdims=True), eps2))
    t_bf = (t * (t_scale * (1.0 / (temperature * target_sharpen_temperature)))
            ).astype(jnp.bfloat16)
    p_bf = (p * p_scale).astype(jnp.bfloat16)
    p_bf16_ref[...] = p_bf                                   # reused by pass 2

    dn = (((1,), (1,)), ((), ()))
    logits = lax.dot_general(t_bf, p_bf, dn,
                             preferred_element_type=jnp.float32)   # (B, K)

    m = jnp.max(logits, axis=1, keepdims=True)
    e = jnp.exp(logits - m)
    tp = e * (1.0 / jnp.sum(e, axis=1, keepdims=True))       # sharpened probs

    if sinkhorn_iterations > 0:
        # Transpose-free sinkhorn; constant divides folded into the reciprocals;
        # the final /num_targets cancels exactly with the trailing *num_targets.
        inv_k = 1.0 / num_prototypes
        inv_b = 1.0 / num_targets
        q = tp * (1.0 / jnp.sum(tp))
        for it in range(sinkhorn_iterations):
            q = q * (inv_k / jnp.sum(q, axis=0, keepdims=True))    # per-prototype
            row_sum = jnp.sum(q, axis=1, keepdims=True)
            if it + 1 == sinkhorn_iterations:
                q = q / row_sum                                    # *B cancels
            else:
                q = q * (inv_b / row_sum)                          # per-target
    else:
        q = tp
    q_ref[...] = q


# --------------------------------------------------------------------------- #
# pass 2: tiled anchor cross-entropy + power-law KL (grid over anchor rows)
# --------------------------------------------------------------------------- #
def _anchor_ce_kernel(a_ref, p_ref, q_ref, logpow_ref, loss_ref,
                      ce_acc, colsum_acc, *, temperature, pmsn_weight,
                      views_per_tile, num_targets, num_anchors):
    eps2 = 1e-24
    step = pl.program_id(0)

    @pl.when(step == 0)
    def _():
        ce_acc[...] = jnp.zeros_like(ce_acc)
        colsum_acc[...] = jnp.zeros_like(colsum_acc)

    # Row-normalize in f32 (fold 1/temperature into the scale), then cast the
    # scaled operand to bf16 so the MXU runs at full bf16 rate (f32 accumulate).
    a = a_ref[...].astype(jnp.float32)                       # (TILE_A, D)
    a_scale = lax.rsqrt(jnp.maximum(jnp.sum(a * a, axis=1, keepdims=True), eps2))
    a_bf = (a * (a_scale * (1.0 / temperature))).astype(jnp.bfloat16)

    dn = (((1,), (1,)), ((), ()))
    logits = lax.dot_general(a_bf, p_ref[...], dn,
                             preferred_element_type=jnp.float32)   # (TILE_A, K)

    # Single-exp softmax + log-softmax (all elementwise math in f32).
    m = jnp.max(logits, axis=1, keepdims=True)
    shifted = logits - m
    e = jnp.exp(shifted)
    s = jnp.sum(e, axis=1, keepdims=True)
    probs = e * (1.0 / s)                                     # (TILE_A, K)
    log_probs = shifted - jnp.log(s)                          # never -inf

    # CE partial: the tile holds whole views, so sum log-probs over the views
    # first (static row slices, no 3-D reshape, q not repeated).
    view_sum = log_probs[0:num_targets, :]
    for v in range(1, views_per_tile):
        view_sum = view_sum + log_probs[v * num_targets:(v + 1) * num_targets, :]
    ce_acc[...] = ce_acc[...] - jnp.sum(q_ref[...] * view_sum)
    colsum_acc[...] = colsum_acc[...] + jnp.sum(probs, axis=0, keepdims=True)

    @pl.when(step == pl.num_programs(0) - 1)
    def _():
        inv_a = 1.0 / num_anchors
        q_mean = colsum_acc[...] * inv_a                      # (1, K)
        kl = jnp.sum(q_mean * (jnp.log(q_mean) - logpow_ref[...]))
        loss_ref[...] = ce_acc[...] * inv_a + pmsn_weight * kl


# --------------------------------- helpers ---------------------------------- #
def _vmem_budget_bytes():
    """Generation-aware scoped-VMEM cap: ~80% of physical VMEM, min 8 MiB."""
    try:
        cap = int(pltpu.get_tpu_info().vmem_capacity_bytes)
    except Exception:                      # conservative fallback (v7x size)
        cap = 64 << 20
    return max(int(cap * 0.80), 8 << 20)


def _choose_views_per_tile(num_views, num_targets, max_tile_rows):
    """Tiles cover whole views so q pairs with anchor rows without masking.

    Tile row count must be a multiple of 8 (sublane) unless it equals the full
    anchor count; prefer the largest whole-view tile <= max_tile_rows.
    """
    candidates = [vt for vt in range(1, num_views + 1)
                  if num_views % vt == 0 and (vt * num_targets) % 8 == 0]
    if not candidates:
        return num_views                   # monolithic fallback: block == full array
    fitting = [vt for vt in candidates
               if vt * num_targets <= max(max_tile_rows, num_targets)]
    return max(fitting) if fitting else min(candidates)


# --------------------------------- wrapper ----------------------------------- #
def pmsn_loss(anchors, targets, prototypes, power_law, *, temperature=0.1,
              sinkhorn_iterations=3, pmsn_weight=1.0,
              target_sharpen_temperature=0.25, max_tile_rows=1024):
    num_anchors, dim = anchors.shape
    num_targets = targets.shape[0]
    num_prototypes = prototypes.shape[0]
    assert num_anchors % num_targets == 0, (
        "anchors must be view-major: (num_views * batch, dim)")
    num_views = num_anchors // num_targets

    budget = _vmem_budget_bytes()

    # ---- pass 1: q + normalized bf16 prototypes (once, outside the tile loop) ----
    tq_kernel = functools.partial(
        _target_q_kernel, temperature=float(temperature),
        target_sharpen_temperature=float(target_sharpen_temperature),
        sinkhorn_iterations=int(sinkhorn_iterations),
        num_targets=num_targets, num_prototypes=num_prototypes)
    need1 = (4 * (num_targets + num_prototypes) * dim
             + 16 * num_targets * num_prototypes + (2 << 20))
    q, p_bf16 = pl.pallas_call(
        tq_kernel,
        out_shape=(jax.ShapeDtypeStruct((num_targets, num_prototypes), jnp.float32),
                   jax.ShapeDtypeStruct((num_prototypes, dim), jnp.bfloat16)),
        in_specs=[pl.BlockSpec(memory_space=pltpu.MemorySpace.VMEM)] * 2,
        out_specs=(pl.BlockSpec(memory_space=pltpu.MemorySpace.VMEM),) * 2,
        compiler_params=pltpu.CompilerParams(
            vmem_limit_bytes=int(min(max(2 * need1, 8 << 20), budget))),
    )(targets, prototypes)

    # ---- pass 2: grid over anchor-row tiles --------------------------------------
    views_per_tile = _choose_views_per_tile(num_views, num_targets, max_tile_rows)
    tile_rows = views_per_tile * num_targets
    num_tiles = num_views // views_per_tile

    # log(power_law) precomputed once (removes a per-call EUP log from the kernel).
    log_power = jnp.log(power_law.astype(jnp.float32)).reshape(1, num_prototypes)

    anchor_kernel = functools.partial(
        _anchor_ce_kernel, temperature=float(temperature),
        pmsn_weight=float(pmsn_weight), views_per_tile=views_per_tile,
        num_targets=num_targets, num_anchors=num_anchors)

    need2 = (2 * 4 * tile_rows * dim                 # double-buffered anchor tile (f32)
             + 2 * num_prototypes * dim              # resident bf16 prototypes
             + 4 * num_targets * num_prototypes      # resident q
             + 6 * 4 * tile_rows * num_prototypes    # live (tile, K) f32 intermediates
             + 8 * num_prototypes)
    vmem2 = int(min(max(2 * need2 + (4 << 20), 8 << 20), budget))

    # TODO(synk): on v7x, mark the anchor axis "parallel" and emit per-core partial
    # (ce, colsum) outputs combined by a tiny follow-up kernel so both TensorCores
    # split the rows; with the cross-step scratch accumulators below the axis must
    # stay "arbitrary".
    # TODO(synk): if (num_targets, K) q itself outgrows VMEM, also block q along the
    # target axis (q block index = i % blocks_per_view) instead of keeping it resident.
    out = pl.pallas_call(
        anchor_kernel,
        out_shape=jax.ShapeDtypeStruct((1, 1), jnp.float32),
        grid_spec=pltpu.PrefetchScalarGridSpec(
            num_scalar_prefetch=0,
            grid=(num_tiles,),
            in_specs=[
                pl.BlockSpec((tile_rows, dim), lambda i: (i, 0)),             # streamed
                pl.BlockSpec((num_prototypes, dim), lambda i: (0, 0)),        # resident
                pl.BlockSpec((num_targets, num_prototypes), lambda i: (0, 0)),
                pl.BlockSpec((1, num_prototypes), lambda i: (0, 0)),
            ],
            out_specs=pl.BlockSpec((1, 1), lambda i: (0, 0)),
            scratch_shapes=[pltpu.VMEM((1, 1), jnp.float32),
                            pltpu.VMEM((1, num_prototypes), jnp.float32)]),
        compiler_params=pltpu.CompilerParams(
            dimension_semantics=("arbitrary",),
            vmem_limit_bytes=vmem2),
    )(anchors, p_bf16, q, log_power)
    return out[0, 0]


# --------------------------- pure-JAX reference ----------------------------- #
def _l2_normalize_ref(x, eps=1e-12):
    norm = jnp.sqrt(jnp.sum(x * x, axis=1, keepdims=True))
    return x / jnp.maximum(norm, eps)


def pmsn_loss_ref(anchors, targets, prototypes, power_law, temperature=0.1,
                  sinkhorn_iterations=3, pmsn_weight=1.0,
                  target_sharpen_temperature=0.25):
    num_views = anchors.shape[0] // targets.shape[0]
    a = _l2_normalize_ref(anchors)
    t = _l2_normalize_ref(targets)
    p = _l2_normalize_ref(prototypes)
    ap = jax.nn.softmax(a @ p.T / temperature, axis=1)
    tp = jax.nn.softmax(t @ p.T / temperature, axis=1)
    tp = tp ** (1.0 / target_sharpen_temperature)
    tp = tp / tp.sum(1, keepdims=True)
    B, K = tp.shape
    q = tp / tp.sum()
    for _ in range(sinkhorn_iterations):
        q = q / q.sum(0, keepdims=True) / K
        q = q / q.sum(1, keepdims=True) / B
    q = q * B
    tp_rep = jnp.tile(q, (num_views, 1))
    loss = jnp.mean(jnp.sum(-tp_rep * jnp.log(ap), axis=1))
    qm = ap.mean(0)
    kl = jnp.sum(qm * (jnp.log(qm) - jnp.log(power_law)))
    return loss + pmsn_weight * kl


if __name__ == "__main__":
    B, V, D, K = 16, 4, 64, 128     # batch, anchor views, feature dim, prototypes
    TAU = 0.25

    key = jax.random.PRNGKey(0)
    k1, k2, k3, k4 = jax.random.split(key, 4)
    anchors = jax.random.normal(k1, (B * V, D), jnp.float32)     # (batch*views, dim)
    targets = jax.random.normal(k2, (B, D), jnp.float32)         # (batch, dim)
    prototypes = jax.random.normal(k3, (K, D), jnp.float32)      # (num_prototypes, dim)

    # Deterministic replacement for np.random.power(tau, size=K):
    # power distribution via inverse CDF, X = U ** (1/tau), then normalized.
    u = jax.random.uniform(k4, (K,), jnp.float32, minval=1e-6, maxval=1.0)
    power_law = u ** (1.0 / TAU)
    power_law = power_law / jnp.sum(power_law)

    # max_tile_rows=16 -> 4 anchor tiles in this small demo, exercising the grid,
    # the resident q/prototypes, and the scratch accumulators.
    fn = jax.jit(functools.partial(pmsn_loss, max_tile_rows=16))
    loss = jax.block_until_ready(fn(anchors, targets, prototypes, power_law))

    ref = pmsn_loss_ref(anchors, targets, prototypes, power_law)
    assert jnp.isfinite(loss), loss
    # Tolerance loosened vs the pure-f32 reference because the similarity matmuls
    # feed the MXU bf16 operands (f32 accumulate), per the perf review.
    assert jnp.allclose(loss, ref, rtol=2e-2, atol=2e-2), (float(loss), float(ref))
    print("KERNEL_OK")
</pallas_src>

<mosaic_0001>
module attributes {stable_mosaic.version = 11 : i64} {
  func.func @_anchor_ce_kernel(%arg0: i32, %arg1: memref<16x64xf32, #tpu.memory_space<vmem>>, %arg2: memref<128x64xbf16, #tpu.memory_space<vmem>>, %arg3: memref<16x128xf32, #tpu.memory_space<vmem>>, %arg4: memref<1x128xf32, #tpu.memory_space<vmem>>, %arg5: memref<1x1xf32, #tpu.memory_space<vmem>>, %arg6: memref<1x1xf32, #tpu.memory_space<vmem>>, %arg7: memref<1x128xf32, #tpu.memory_space<vmem>>) attributes {dimension_semantics = [#tpu.dimension_semantics<arbitrary>], iteration_bounds = array<i64: 4>, scalar_prefetch = 0 : i64, scratch_operands = 2 : i64, tpu.core_type = #tpu.core_type<tc>, window_params = [{transform_indices = @transform_0, window_bounds = array<i64: 16, 64>}, {pipeline_mode = #tpu.pipeline_mode<synchronous>, transform_indices = @transform_1, window_bounds = array<i64: 128, 64>}, {pipeline_mode = #tpu.pipeline_mode<synchronous>, transform_indices = @transform_2, window_bounds = array<i64: 16, 128>}, {pipeline_mode = #tpu.pipeline_mode<synchronous>, transform_indices = @transform_3, window_bounds = array<i64: 1, 128>}, {pipeline_mode = #tpu.pipeline_mode<synchronous>, transform_indices = @transform_4, window_bounds = array<i64: 1, 1>}]} {
    %c0_i32 = arith.constant 0 : i32
    %0 = arith.cmpi eq, %arg0, %c0_i32 : i32
    %1 = arith.extui %0 : i1 to i32
    %c0_i32_0 = arith.constant 0 : i32
    %2 = arith.cmpi ne, %1, %c0_i32_0 : i32
    scf.if %2 {
      %cst_23 = arith.constant 0.000000e+00 : f32
      %49 = vector.broadcast %cst_23 : f32 to vector<1x1xf32>
      %c0_24 = arith.constant 0 : index
      %c0_25 = arith.constant 0 : index
      %50 = vector.load %arg6[%c0_24, %c0_25] : memref<1x1xf32, #tpu.memory_space<vmem>>, vector<1x1xf32>
      tpu.vector_store %arg6[%c0_24, %c0_25], %49 {strides = array<i32>} : memref<1x1xf32, #tpu.memory_space<vmem>>, vector<1x1xf32>,
      %cst_26 = arith.constant 0.000000e+00 : f32
      %51 = vector.broadcast %cst_26 : f32 to vector<1x128xf32>
      %c0_27 = arith.constant 0 : index
      %c0_28 = arith.constant 0 : index
      %52 = vector.load %arg7[%c0_27, %c0_28] : memref<1x128xf32, #tpu.memory_space<vmem>>, vector<1x128xf32>
      tpu.vector_store %arg7[%c0_27, %c0_28], %51 {strides = array<i32>} : memref<1x128xf32, #tpu.memory_space<vmem>>, vector<1x128xf32>,
    } else {
    }
    %c0 = arith.constant 0 : index
    %c0_1 = arith.constant 0 : index
    %3 = vector.load %arg1[%c0, %c0_1] : memref<16x64xf32, #tpu.memory_space<vmem>>, vector<16x64xf32>
    %4 = arith.mulf %3, %3 : vector<16x64xf32>
    %cst = arith.constant dense<0.000000e+00> : vector<16xf32>
    %5 = vector.multi_reduction <add>, %4, %cst [1] : vector<16x64xf32> to vector<16xf32>
    %6 = vector.shape_cast %5 : vector<16xf32> to vector<16x1xf32>
    %cst_2 = arith.constant 1.000000e-24 : f32
    %7 = vector.broadcast %cst_2 : f32 to vector<16x1xf32>
    %8 = arith.maximumf %6, %7 : vector<16x1xf32>
    %9 = math.rsqrt %8 : vector<16x1xf32>
    %cst_3 = arith.constant 1.000000e+01 : f32
    %10 = vector.broadcast %cst_3 : f32 to vector<16x1xf32>
    %11 = arith.mulf %9, %10 : vector<16x1xf32>
    %12 = vector.broadcast %11 : vector<16x1xf32> to vector<16x64xf32>
    %13 = arith.mulf %3, %12 : vector<16x64xf32>
    %14 = arith.truncf %13 : vector<16x64xf32> to vector<16x64xbf16>
    %c0_4 = arith.constant 0 : index
    %c0_5 = arith.constant 0 : index
    %15 = vector.load %arg2[%c0_4, %c0_5] : memref<128x64xbf16, #tpu.memory_space<vmem>>, vector<128x64xbf16>
    %cst_6 = arith.constant dense<0.000000e+00> : vector<16x128xf32>
    %16 = tpu.matmul %14, %15, %cst_6 {dimension_numbers = #tpu.dot_dimension_numbers<[1], [1], [0], [0], [0, 0, 1, 0], [], []>} : vector<16x64xbf16>, vector<128x64xbf16>, vector<16x128xf32> -> vector<16x128xf32>
    %cst_7 = arith.constant dense<0xFF800000> : vector<16xf32>
    %17 = vector.multi_reduction <maximumf>, %16, %cst_7 [1] : vector<16x128xf32> to vector<16xf32>
    %18 = vector.shape_cast %17 : vector<16xf32> to vector<16x1xf32>
    %19 = vector.broadcast %18 : vector<16x1xf32> to vector<16x128xf32>
    %20 = arith.subf %16, %19 : vector<16x128xf32>
    %21 = math.exp %20 : vector<16x128xf32>
    %cst_8 = arith.constant dense<0.000000e+00> : vector<16xf32>
    %22 = vector.multi_reduction <add>, %21, %cst_8 [1] : vector<16x128xf32> to vector<16xf32>
    %23 = vector.shape_cast %22 : vector<16xf32> to vector<16x1xf32>
    %cst_9 = arith.constant 1.000000e+00 : f32
    %24 = vector.broadcast %cst_9 : f32 to vector<16x1xf32>
    %25 = arith.divf %24, %23 : vector<16x1xf32>
    %26 = vector.broadcast %25 : vector<16x1xf32> to vector<16x128xf32>
    %27 = arith.mulf %21, %26 : vector<16x128xf32>
    %28 = math.log %23 : vector<16x1xf32>
    %29 = vector.broadcast %28 : vector<16x1xf32> to vector<16x128xf32>
    %30 = arith.subf %20, %29 : vector<16x128xf32>
    %c0_10 = arith.constant 0 : index
    %c0_11 = arith.constant 0 : index
    %31 = vector.load %arg6[%c0_10, %c0_11] : memref<1x1xf32, #tpu.memory_space<vmem>>, vector<1x1xf32>
    %c0_12 = arith.constant 0 : index
    %c0_13 = arith.constant 0 : index
    %32 = vector.load %arg3[%c0_12, %c0_13] : memref<16x128xf32, #tpu.memory_space<vmem>>, vector<16x128xf32>
    %33 = arith.mulf %32, %30 : vector<16x128xf32>
    %34 = vector.shape_cast %33 : vector<16x128xf32> to vector<1x16x128xf32>
    %cst_14 = arith.constant dense<0.000000e+00> : vector<1xf32>
    %35 = vector.multi_reduction <add>, %34, %cst_14 [1, 2] : vector<1x16x128xf32> to vector<1xf32>
    %36 = vector.shape_cast %35 : vector<1xf32> to vector<1x1x1xf32>
    %37 = vector.extract %36[0, 0, 0] : f32 from vector<1x1x1xf32>
    %38 = vector.broadcast %37 : f32 to vector<1x1xf32>
    %39 = arith.subf %31, %38 : vector<1x1xf32>
    %c0_15 = arith.constant 0 : index
    %c0_16 = arith.constant 0 : index
    %40 = vector.load %arg6[%c0_15, %c0_16] : memref<1x1xf32, #tpu.memory_space<vmem>>, vector<1x1xf32>
    tpu.vector_store %arg6[%c0_15, %c0_16], %39 {strides = array<i32>} : memref<1x1xf32, #tpu.memory_space<vmem>>, vector<1x1xf32>,
    %c0_17 = arith.constant 0 : index
    %c0_18 = arith.constant 0 : index
    %41 = vector.load %arg7[%c0_17, %c0_18] : memref<1x128xf32, #tpu.memory_space<vmem>>, vector<1x128xf32>
    %cst_19 = arith.constant dense<0.000000e+00> : vector<128xf32>
    %42 = vector.multi_reduction <add>, %27, %cst_19 [0] : vector<16x128xf32> to vector<128xf32>
    %43 = vector.shape_cast %42 : vector<128xf32> to vector<1x128xf32>
    %44 = arith.addf %41, %43 : vector<1x128xf32>
    %c0_20 = arith.constant 0 : index
    %c0_21 = arith.constant 0 : index
    %45 = vector.load %arg7[%c0_20, %c0_21] : memref<1x128xf32, #tpu.memory_space<vmem>>, vector<1x128xf32>
    tpu.vector_store %arg7[%c0_20, %c0_21], %44 {strides = array<i32>} : memref<1x128xf32, #tpu.memory_space<vmem>>, vector<1x128xf32>,
    %c3_i32 = arith.constant 3 : i32
    %46 = arith.cmpi eq, %arg0, %c3_i32 : i32
    %47 = arith.extui %46 : i1 to i32
    %c0_i32_22 = arith.constant 0 : i32
    %48 = arith.cmpi ne, %47, %c0_i32_22 : i32
    scf.if %48 {
      %c0_23 = arith.constant 0 : index
      %c0_24 = arith.constant 0 : index
      %49 = vector.load %arg7[%c0_23, %c0_24] : memref<1x128xf32, #tpu.memory_space<vmem>>, vector<1x128xf32>
      %cst_25 = arith.constant 1.562500e-02 : f32
      %50 = vector.broadcast %cst_25 : f32 to vector<1x128xf32>
      %51 = arith.mulf %49, %50 : vector<1x128xf32>
      %52 = math.log %51 : vector<1x128xf32>
      %c0_26 = arith.constant 0 : index
      %c0_27 = arith.constant 0 : index
      %53 = vector.load %arg4[%c0_26, %c0_27] : memref<1x128xf32, #tpu.memory_space<vmem>>, vector<1x128xf32>
      %54 = arith.subf %52, %53 : vector<1x128xf32>
      %55 = arith.mulf %51, %54 : vector<1x128xf32>
      %56 = vector.shape_cast %55 : vector<1x128xf32> to vector<1x1x128xf32>
      %cst_28 = arith.constant dense<0.000000e+00> : vector<1xf32>
      %57 = vector.multi_reduction <add>, %56, %cst_28 [1, 2] : vector<1x1x128xf32> to vector<1xf32>
      %58 = vector.shape_cast %57 : vector<1xf32> to vector<1x1x1xf32>
      %59 = vector.extract %58[0, 0, 0] : f32 from vector<1x1x1xf32>
      %c0_29 = arith.constant 0 : index
      %c0_30 = arith.constant 0 : index
      %60 = vector.load %arg6[%c0_29, %c0_30] : memref<1x1xf32, #tpu.memory_space<vmem>>, vector<1x1xf32>
      %cst_31 = arith.constant 1.562500e-02 : f32
      %61 = vector.broadcast %cst_31 : f32 to vector<1x1xf32>
      %62 = arith.mulf %60, %61 : vector<1x1xf32>
      %cst_32 = arith.constant 1.000000e+00 : f32
      %63 = arith.mulf %cst_32, %59 : f32
      %64 = vector.broadcast %63 : f32 to vector<1x1xf32>
      %65 = arith.addf %62, %64 : vector<1x1xf32>
      %c0_33 = arith.constant 0 : index
      %c0_34 = arith.constant 0 : index
      %66 = vector.load %arg5[%c0_33, %c0_34] : memref<1x1xf32, #tpu.memory_space<vmem>>, vector<1x1xf32>
      tpu.vector_store %arg5[%c0_33, %c0_34], %65 {strides = array<i32>} : memref<1x1xf32, #tpu.memory_space<vmem>>, vector<1x1xf32>,
    } else {
    }
    return
  }
  func.func @transform_0(%arg0: i32) -> (i32, i32) {
    %c0_i32 = arith.constant 0 : i32
    %c0_i32_0 = arith.constant 0 : i32
    return %arg0, %c0_i32 : i32, i32
  }
  func.func @transform_1(%arg0: i32) -> (i32, i32) {
    %c0_i32 = arith.constant 0 : i32
    %c0_i32_0 = arith.constant 0 : i32
    %c0_i32_1 = arith.constant 0 : i32
    return %c0_i32, %c0_i32_0 : i32, i32
  }
  func.func @transform_2(%arg0: i32) -> (i32, i32) {
    %c0_i32 = arith.constant 0 : i32
    %c0_i32_0 = arith.constant 0 : i32
    %c0_i32_1 = arith.constant 0 : i32
    return %c0_i32, %c0_i32_0 : i32, i32
  }
  func.func @transform_3(%arg0: i32) -> (i32, i32) {
    %c0_i32 = arith.constant 0 : i32
    %c0_i32_0 = arith.constant 0 : i32
    %c0_i32_1 = arith.constant 0 : i32
    return %c0_i32, %c0_i32_0 : i32, i32
  }
  func.func @transform_4(%arg0: i32) -> (i32, i32) {
    %c0_i32 = arith.constant 0 : i32
    %c0_i32_0 = arith.constant 0 : i32
    %c0_i32_1 = arith.constant 0 : i32
    return %c0_i32, %c0_i32_0 : i32, i32
  }
}

module attributes {stable_mosaic.version = 11 : i64} {
  func.func @_target_q_kernel(%arg0: memref<16x64xf32, #tpu.memory_space<vmem>>, %arg1: memref<128x64xf32, #tpu.memory_space<vmem>>, %arg2: memref<16x128xf32, #tpu.memory_space<vmem>>, %arg3: memref<128x64xbf16, #tpu.memory_space<vmem>>) attributes {dimension_semantics = [], scalar_prefetch = 0 : i64, scratch_operands = 0 : i64, tpu.core_type = #tpu.core_type<tc>} {
    %c0 = arith.constant 0 : index
    %c0_0 = arith.constant 0 : index
    %0 = vector.load %arg0[%c0, %c0_0] : memref<16x64xf32, #tpu.memory_space<vmem>>, vector<16x64xf32>
    %c0_1 = arith.constant 0 : index
    %c0_2 = arith.constant 0 : index
    %1 = vector.load %arg1[%c0_1, %c0_2] : memref<128x64xf32, #tpu.memory_space<vmem>>, vector<128x64xf32>
    %2 = arith.mulf %0, %0 : vector<16x64xf32>
    %cst = arith.constant dense<0.000000e+00> : vector<16xf32>
    %3 = vector.multi_reduction <add>, %2, %cst [1] : vector<16x64xf32> to vector<16xf32>
    %4 = vector.shape_cast %3 : vector<16xf32> to vector<16x1xf32>
    %cst_3 = arith.constant 1.000000e-24 : f32
    %5 = vector.broadcast %cst_3 : f32 to vector<16x1xf32>
    %6 = arith.maximumf %4, %5 : vector<16x1xf32>
    %7 = math.rsqrt %6 : vector<16x1xf32>
    %8 = arith.mulf %1, %1 : vector<128x64xf32>
    %cst_4 = arith.constant dense<0.000000e+00> : vector<128xf32>
    %9 = vector.multi_reduction <add>, %8, %cst_4 [1] : vector<128x64xf32> to vector<128xf32>
    %10 = vector.shape_cast %9 : vector<128xf32> to vector<128x1xf32>
    %cst_5 = arith.constant 1.000000e-24 : f32
    %11 = vector.broadcast %cst_5 : f32 to vector<128x1xf32>
    %12 = arith.maximumf %10, %11 : vector<128x1xf32>
    %13 = math.rsqrt %12 : vector<128x1xf32>
    %cst_6 = arith.constant 4.000000e+01 : f32
    %14 = vector.broadcast %cst_6 : f32 to vector<16x1xf32>
    %15 = arith.mulf %7, %14 : vector<16x1xf32>
    %16 = vector.broadcast %15 : vector<16x1xf32> to vector<16x64xf32>
    %17 = arith.mulf %0, %16 : vector<16x64xf32>
    %18 = arith.truncf %17 : vector<16x64xf32> to vector<16x64xbf16>
    %19 = vector.broadcast %13 : vector<128x1xf32> to vector<128x64xf32>
    %20 = arith.mulf %1, %19 : vector<128x64xf32>
    %21 = arith.truncf %20 : vector<128x64xf32> to vector<128x64xbf16>
    %c0_7 = arith.constant 0 : index
    %c0_8 = arith.constant 0 : index
    %22 = vector.load %arg3[%c0_7, %c0_8] : memref<128x64xbf16, #tpu.memory_space<vmem>>, vector<128x64xbf16>
    tpu.vector_store %arg3[%c0_7, %c0_8], %21 {strides = array<i32>} : memref<128x64xbf16, #tpu.memory_space<vmem>>, vector<128x64xbf16>,
    %cst_9 = arith.constant dense<0.000000e+00> : vector<16x128xf32>
    %23 = tpu.matmul %18, %21, %cst_9 {dimension_numbers = #tpu.dot_dimension_numbers<[1], [1], [0], [0], [0, 0, 1, 0], [], []>} : vector<16x64xbf16>, vector<128x64xbf16>, vector<16x128xf32> -> vector<16x128xf32>
    %cst_10 = arith.constant dense<0xFF800000> : vector<16xf32>
    %24 = vector.multi_reduction <maximumf>, %23, %cst_10 [1] : vector<16x128xf32> to vector<16xf32>
    %25 = vector.shape_cast %24 : vector<16xf32> to vector<16x1xf32>
    %26 = vector.broadcast %25 : vector<16x1xf32> to vector<16x128xf32>
    %27 = arith.subf %23, %26 : vector<16x128xf32>
    %28 = math.exp %27 : vector<16x128xf32>
    %cst_11 = arith.constant dense<0.000000e+00> : vector<16xf32>
    %29 = vector.multi_reduction <add>, %28, %cst_11 [1] : vector<16x128xf32> to vector<16xf32>
    %30 = vector.shape_cast %29 : vector<16xf32> to vector<16x1xf32>
    %cst_12 = arith.constant 1.000000e+00 : f32
    %31 = vector.broadcast %cst_12 : f32 to vector<16x1xf32>
    %32 = arith.divf %31, %30 : vector<16x1xf32>
    %33 = vector.broadcast %32 : vector<16x1xf32> to vector<16x128xf32>
    %34 = arith.mulf %28, %33 : vector<16x128xf32>
    %35 = vector.shape_cast %34 : vector<16x128xf32> to vector<1x16x128xf32>
    %cst_13 = arith.constant dense<0.000000e+00> : vector<1xf32>
    %36 = vector.multi_reduction <add>, %35, %cst_13 [1, 2] : vector<1x16x128xf32> to vector<1xf32>
    %37 = vector.shape_cast %36 : vector<1xf32> to vector<1x1x1xf32>
    %38 = vector.extract %37[0, 0, 0] : f32 from vector<1x1x1xf32>
    %cst_14 = arith.constant 1.000000e+00 : f32
    %39 = arith.divf %cst_14, %38 : f32
    %40 = vector.broadcast %39 : f32 to vector<16x128xf32>
    %41 = arith.mulf %34, %40 : vector<16x128xf32>
    %cst_15 = arith.constant dense<0.000000e+00> : vector<128xf32>
    %42 = vector.multi_reduction <add>, %41, %cst_15 [0] : vector<16x128xf32> to vector<128xf32>
    %43 = vector.shape_cast %42 : vector<128xf32> to vector<1x128xf32>
    %cst_16 = arith.constant 7.812500e-03 : f32
    %44 = vector.broadcast %cst_16 : f32 to vector<1x128xf32>
    %45 = arith.divf %44, %43 : vector<1x128xf32>
    %46 = vector.broadcast %45 : vector<1x128xf32> to vector<16x128xf32>
    %47 = arith.mulf %41, %46 : vector<16x128xf32>
    %cst_17 = arith.constant dense<0.000000e+00> : vector<16xf32>
    %48 = vector.multi_reduction <add>, %47, %cst_17 [1] : vector<16x128xf32> to vector<16xf32>
    %49 = vector.shape_cast %48 : vector<16xf32> to vector<16x1xf32>
    %cst_18 = arith.constant 6.250000e-02 : f32
    %50 = vector.broadcast %cst_18 : f32 to vector<16x1xf32>
    %51 = arith.divf %50, %49 : vector<16x1xf32>
    %52 = vector.broadcast %51 : vector<16x1xf32> to vector<16x128xf32>
    %53 = arith.mulf %47, %52 : vector<16x128xf32>
    %cst_19 = arith.constant dense<0.000000e+00> : vector<128xf32>
    %54 = vector.multi_reduction <add>, %53, %cst_19 [0] : vector<16x128xf32> to vector<128xf32>
    %55 = vector.shape_cast %54 : vector<128xf32> to vector<1x128xf32>
    %cst_20 = arith.constant 7.812500e-03 : f32
    %56 = vector.broadcast %cst_20 : f32 to vector<1x128xf32>
    %57 = arith.divf %56, %55 : vector<1x128xf32>
    %58 = vector.broadcast %57 : vector<1x128xf32> to vector<16x128xf32>
    %59 = arith.mulf %53, %58 : vector<16x128xf32>
    %cst_21 = arith.constant dense<0.000000e+00> : vector<16xf32>
    %60 = vector.multi_reduction <add>, %59, %cst_21 [1] : vector<16x128xf32> to vector<16xf32>
    %61 = vector.shape_cast %60 : vector<16xf32> to vector<16x1xf32>
    %cst_22 = arith.constant 6.250000e-02 : f32
    %62 = vector.broadcast %cst_22 : f32 to vector<16x1xf32>
    %63 = arith.divf %62, %61 : vector<16x1xf32>
    %64 = vector.broadcast %63 : vector<16x1xf32> to vector<16x128xf32>
    %65 = arith.mulf %59, %64 : vector<16x128xf32>
    %cst_23 = arith.constant dense<0.000000e+00> : vector<128xf32>
    %66 = vector.multi_reduction <add>, %65, %cst_23 [0] : vector<16x128xf32> to vector<128xf32>
    %67 = vector.shape_cast %66 : vector<128xf32> to vector<1x128xf32>
    %cst_24 = arith.constant 7.812500e-03 : f32
    %68 = vector.broadcast %cst_24 : f32 to vector<1x128xf32>
    %69 = arith.divf %68, %67 : vector<1x128xf32>
    %70 = vector.broadcast %69 : vector<1x128xf32> to vector<16x128xf32>
    %71 = arith.mulf %65, %70 : vector<16x128xf32>
    %cst_25 = arith.constant dense<0.000000e+00> : vector<16xf32>
    %72 = vector.multi_reduction <add>, %71, %cst_25 [1] : vector<16x128xf32> to vector<16xf32>
    %73 = vector.shape_cast %72 : vector<16xf32> to vector<16x1xf32>
    %74 = vector.broadcast %73 : vector<16x1xf32> to vector<16x128xf32>
    %75 = arith.divf %71, %74 : vector<16x128xf32>
    %c0_26 = arith.constant 0 : index
    %c0_27 = arith.constant 0 : index
    %76 = vector.load %arg2[%c0_26, %c0_27] : memref<16x128xf32, #tpu.memory_space<vmem>>, vector<16x128xf32>
    tpu.vector_store %arg2[%c0_26, %c0_27], %75 {strides = array<i32>} : memref<16x128xf32, #tpu.memory_space<vmem>>, vector<16x128xf32>,
    return
  }
}

</mosaic_0001>

<bundles_post_ra>
// kernel: pmsn_loss.3
= control target key start
LH: loop header
LB: loop body
LE: loop exit
PB: predicated region body
PF: predicated region fallthrough
CT: control target
= control target key end

     0   :  { %9 = vsyncpa [#allocation5], 0  ;;  %s642_s15 = smov 0   ;;  %s711_s0 = inlined_call_operand.vmem [shape: f32[64,64], index: 0, kind: input, shape index: {}]   ;;  %s712_s1 = inlined_call_operand.vmem [shape: bf16[128,64], index: 1, kind: input, shape index: {}]   ;;  %s713_s2 = inlined_call_operand.vmem [shape: f32[16,128], index: 2, kind: input, shape index: {}]   ;;  %s714_s3 = inlined_call_operand.vmem [shape: f32[1,128], index: 3, kind: input, shape index: {}]   ;;  %s715_s4 = inlined_call_operand.hbm [shape: f32[1,1], index: 4, kind: output, shape index: {}]  }
   0x1 LB: > { %s648_s16 = sadd.s32 4294967295, %s613_s15   ;;  %p487_p0 = scmp.ge.s32.totalorder %s613_s15, 1  ;;  %s613_s15 = sphi %s642_s15, %s15_s15  }
   0x2   : > { %p159_p1 = scmp.lt.s32.totalorder %s613_s15, 5 }
   0x4   : > { %p160_p2 = pnand %p487_p0, %p159_p1 }
   0x5   : > { %s488_s17 = sshll.u32 (!%p160_p2), %s648_s16, 1  ;;  %p490_p4 = scmp.ne.s32.totalorder (!%p160_p2), %s648_s16, 0 }
   0x6   : > { %163 = sbr.rel (%p160_p2) target bundleno = 952 (0x3b8), region = 36  ;;  %p181_p3 = scmp.lt.s32.totalorder (!%p160_p2), %s488_s17, 7 }
   0xb   : > { %s717_s17 = smov (!%p181_p3, %s488_s17), 7  ;;  %189 = sbr.rel (%p490_p4) target bundleno = 19 (0x13), region = 40 }
   0xc   : > { %s489_s18 = sshll.u32 %s717_s17, 3 }
   0xd   : > { %s184_s21 = scalar_lea.vmem %s711_s0, %s489_s18 }
  0x10   : > { %vm190_vm0 = vcmask 0   ;;  %v615_v0 = vmov 0.0  }
  0x11   : > { %191 = vst.msk [vmem:[#allocation2] sm:$0x1] %vm190_vm0, %v615_v0 }
  0x12   : > { %192 = vst [vmem:[#allocation3] sm:$0x1] %v615_v0 }
  0x13 PF: > { %v193_v1 = vld [vmem:[%s184_s21] sm:$0xff]  ;;  %vm197_vm1 = vcmask 523264   ;;  %v536_v2 = vld [vmem:[%s712_s1 + $0x38] sm:$0xff]  ;;  %v194_v4 = vld [vmem:[%s184_s21 + $0x8] sm:$0xff]  ;;  %vm397_vm0 = vcmask 0   ;;  %p524_p5 = scmp.ne.s32.totalorder %s648_s16, 3 }
  0x14   : > { %v195_v3 = vmul.f32 %v193_v1, %v193_v1  ;;  %v312_v5 = vsel %vm197_vm1, %v536_v2, 0  ;;  %v535_v7 = vld [vmem:[%s712_s1 + $0x30] sm:$0xff]  ;;  %v196_v8 = vmul.f32 %v194_v4, %v194_v4  ;;  %v534_v11 = vld [vmem:[%s712_s1 + $0x28] sm:$0xff]  ;;  %v533_v13 = vld [vmem:[%s712_s1 + $0x20] sm:$0xff] }
  0x15   : > { %314 = vmatpush.bf16.xpose.msra.mxu0 %v312_v5  ;;  %v309_v9 = vsel %vm197_vm1, %v535_v7, 0  ;;  %v306_v12 = vsel %vm197_vm1, %v534_v11, 0  ;;  %v303_v14 = vsel %vm197_vm1, %v533_v13, 0  ;;  %v532_v15 = vld [vmem:[%s712_s1 + $0x18] sm:$0xff]  ;;  %v531_v17 = vld [vmem:[%s712_s1 + $0x10] sm:$0xff]  ;;  %v530_v19 = vld [vmem:[%s712_s1 + $0x8] sm:$0xff] }
  0x16   : > { %v198_v6 = vsel %vm197_vm1, %v195_v3, 0.0  ;;  %v201_v10 = vsel %vm197_vm1, %v196_v8, 0.0  ;;  %v300_v16 = vsel %vm197_vm1, %v532_v15, 0  ;;  %v297_v18 = vsel %vm197_vm1, %v531_v17, 0  ;;  %v529_v21 = vld [vmem:[%s712_s1] sm:$0xff] }
  0x17   : > { %199 = vadd.xlane.f32.xlu0 %v198_v6  ;;  %v294_v20 = vsel %vm197_vm1, %v530_v19, 0  ;;  %v291_v22 = vsel %vm197_vm1, %v529_v21, 0 }
  0x1d   : > { %315 = vmatpush.bf16.xpose.msra.mxu0 %v309_v9  ;;  %v381_v9 = vld [vmem:[%s713_s2] sm:$0xff] }
  0x1f   : > { %202 = vadd.xlane.f32.xlu0 %v201_v10  ;;  %v382_v10 = vld [vmem:[%s713_s2 + $0x8] sm:$0xff] }
  0x25   : > { %316 = vmatpush.bf16.xpose.msra.mxu0 %v306_v12 }
  0x2d   : > { %317 = vmatpush.bf16.xpose.msra.mxu0 %v303_v14 }
  0x35   : > { %318 = vmatpush.bf16.xpose.msra.mxu0 %v300_v16 }
  0x3d   : > { %319 = vmatpush.bf16.xpose.msra.mxu0 %v297_v18 }
  0x45   : > { %320 = vmatpush.bf16.xpose.msra.mxu0 %v294_v20 }
  0x4d   : > { %321 = vmatpush.bf16.xpose.msra.mxu0 %v291_v22 }
  0x8a   : > { %v200_v23 = vpop.xlane.xlu0 %199 }
  0x8b   : > { %v204_v24 = vmax.f32 %v200_v23, 1e-24 }
  0x8d   : > { %557 = vrsqrt.f32 %v204_v24  ;;  %vm212_vm3 = vweird.f32 %v204_v24 }
  0x92   : > { %v203_v25 = vpop.xlane.xlu0 %202 }
  0x93   : > { %v558_v26 = vpop.eup %557  ;;  %v205_v27 = vmax.f32 %v203_v25, 1e-24 }
  0x94   : > { %v207_v28 = vmul.f32 %v558_v26, %v204_v24  ;;  %vm213_vm2 = vweird.f32 %v558_v26 }
  0x95   : > { %559 = vrsqrt.f32 %v205_v27  ;;  %vm214_vm4 = vmor %vm212_vm3, %vm213_vm2  ;;  %vm222_vm6 = vweird.f32 %v205_v27 }
  0x96   : > { %v208_v29 = vmul.f32 %v558_v26, %v207_v28 }
  0x98   : > { %v209_v30 = vmul.f32 0.5, %v208_v29 }
  0x9a   : > { %v210_v31 = vsub.f32 1.5, %v209_v30 }
  0x9b   : > { %v560_v32 = vpop.eup %559 }
  0x9c   : > { %v217_v33 = vmul.f32 %v560_v32, %v205_v27  ;;  %v211_v34 = vmul.f32 %v558_v26, %v210_v31  ;;  %vm223_vm5 = vweird.f32 %v560_v32 }
  0x9d   : > { %vm224_vm7 = vmor %vm222_vm6, %vm223_vm5 }
  0x9e   : > { %v218_v35 = vmul.f32 %v560_v32, %v217_v33  ;;  %v215_v38 = vsel %vm214_vm4, %v558_v26, %v211_v34  ;;  %v399_v33 = vld [vmem:[#allocation3] sm:$0x1] }
  0x9f   : > { %v226_v40 = vmul.f32 10.0, %v215_v38 }
  0xa0   : > { %v219_v36 = vmul.f32 0.5, %v218_v35 }
  0xa1   : > { %v228_v43 = vmul.f32 %v226_v40, %v193_v1 }
  0xa2   : > { %v220_v37 = vsub.f32 1.5, %v219_v36 }
  0xa4   : > { %v221_v39 = vmul.f32 %v560_v32, %v220_v37 }
  0xa6   : > { %v225_v41 = vsel %vm224_vm7, %v560_v32, %v221_v39 }
  0xa7   : > { %v227_v42 = vmul.f32 10.0, %v225_v41 }
  0xa9   : > { %v229_v44 = vmul.f32 %v227_v42, %v194_v4 }
  0xab   : > { %v230_v45 = vpack.c.bf16 %v229_v44, %v228_v43  ;;  %v380_v43 = vld [vmem:[#allocation2] sm:$0x1] }
  0xad   : > { %523 = vmatmul.msk.bf16.vlgmr.msra.gmra.mxu0 %vm197_vm1, %v230_v45 }
 0x12a   : > { %v323_v46 = vpop.f32.mrf.mxu0 }
 0x12b   : > { %328 = vmax.xlane.f32.xlu1 %v323_v46 }
 0x132   : > { %v325_v47 = vpop.f32.mrf.mxu0 }
 0x133   : > { %330 = vmax.xlane.f32.xlu1 %v325_v47 }
 0x19e   : > { %v329_v48 = vpop.xlane.xlu1 %328 }
 0x19f   : > { %v332_v49 = vsub.f32 %v323_v46, %v329_v48 }
 0x1a1   : > { %v334_v50 = vmul.f32 1.442695, %v332_v49 }
 0x1a3   : > { %561 = vpow2.f32 %v334_v50 }
 0x1a6   : > { %v331_v51 = vpop.xlane.xlu1 %330 }
 0x1a7   : > { %v333_v52 = vsub.f32 %v325_v47, %v331_v51 }
 0x1a9   : > { %v562_v53 = vpop.eup %561  ;;  %v336_v54 = vmul.f32 1.442695, %v333_v52 }
 0x1aa   : > { %338 = vadd.xlane.f32.xlu2 %v562_v53 }
 0x1ab   : > { %563 = vpow2.f32 %v336_v54 }
 0x1b1   : > { %v564_v55 = vpop.eup %563 }
 0x1b2   : > { %340 = vadd.xlane.f32.xlu2 %v564_v55 }
 0x21d   : > { %v339_v56 = vpop.xlane.xlu2 %338 }
 0x21e   : > { %565 = vrcp.f32 %v339_v56  ;;  %v353_v4 = vand.u32 2147483648, %v339_v56  ;;  %vm347_vm9 = vweird.f32 %v339_v56  ;;  %v351_v7 = vand.u32 2147483647, %v339_v56 }
 0x21f   : > { %567 = vlog2.f32 %v339_v56 }
 0x220   : > { %v354_v16 = vor.u32 1.1754944e-38, %v353_v4  ;;  %vm352_vm12 = vcmp.eq.f32.partialorder %v351_v7, 8.507059e+37 }
 0x224   : > { %v566_v57 = vpop.eup %565 }
 0x225   : > { %v343_v58 = vmul.f32 %v566_v57, %v339_v56  ;;  %v341_v59 = vpop.xlane.xlu2 %340  ;;  %v568_v60 = vpop.eup %567  ;;  %vm348_vm8 = vweird.f32 %v566_v57 }
 0x226   : > { %569 = vrcp.f32 %v341_v59  ;;  %v375_v63 = vmul.f32 0.6931472, %v568_v60  ;;  %vm349_vm10 = vmor %vm347_vm9, %vm348_vm8  ;;  %v368_v11 = vand.u32 2147483648, %v341_v59  ;;  %v366_v15 = vand.u32 2147483647, %v341_v59 }
 0x227   : > { %v344_v61 = vsub.f32 1.0, %v343_v58  ;;  %571 = vlog2.f32 %v341_v59  ;;  %vm362_vm13 = vweird.f32 %v341_v59 }
 0x228   : > { %v378_v6 = vsub.f32 %v332_v49, %v375_v63  ;;  %v369_v21 = vor.u32 1.1754944e-38, %v368_v11  ;;  %vm367_vm15 = vcmp.eq.f32.partialorder %v366_v15, 8.507059e+37 }
 0x229   : > { %v345_v62 = vmul.f32 %v566_v57, %v344_v61 }
 0x22a   : > { %v383_v17 = vmul.f32 %v381_v9, %v378_v6 }
 0x22b   : > { %v346_v2 = vadd.f32 %v566_v57, %v345_v62 }
 0x22c   : > { %v570_v0 = vpop.eup %569 }
 0x22d   : > { %v572_v1 = vpop.eup %571  ;;  %v358_v3 = vmul.f32 %v570_v0, %v341_v59  ;;  %v350_v13 = vsel %vm349_vm10, %v566_v57, %v346_v2  ;;  %vm363_vm11 = vweird.f32 %v570_v0 }
 0x22e   : > { %v377_v5 = vmul.f32 0.6931472, %v572_v1  ;;  %v355_v20 = vsel %vm352_vm12, %v354_v16, %v350_v13  ;;  %vm364_vm14 = vmor %vm362_vm13, %vm363_vm11 }
 0x22f   : > { %v359_v8 = vsub.f32 1.0, %v358_v3  ;;  %v372_v25 = vmul.f32 %v562_v53, %v355_v20 }
 0x230   : > { %v379_v12 = vsub.f32 %v333_v52, %v377_v5 }
 0x231   : > { %v360_v14 = vmul.f32 %v570_v0, %v359_v8 }
 0x232   : > { %v384_v18 = vmul.f32 %v382_v10, %v379_v12 }
 0x233   : > { %v361_v19 = vadd.f32 %v570_v0, %v360_v14 }
 0x234   : > { %v385_v22 = vadd.f32 %v384_v18, %v383_v17 }
 0x235   : > { %v365_v23 = vsel %vm364_vm14, %v570_v0, %v361_v19 }
 0x236   : > { %v370_v24 = vsel %vm367_vm15, %v369_v21, %v365_v23  ;;  %386 = vadd.xlane.f32.xlu0 %v385_v22 }
 0x237   : > { %v373_v26 = vmul.f32 %v564_v55, %v370_v24 }
 0x239   : > { %v400_v27 = vadd.f32 %v373_v26, %v372_v25 }
 0x23b   : > { %v401_v28 = vrot.slane %v400_v27, 4 }
 0x23d   : > { %v402_v29 = vadd.f32 %v401_v28, %v400_v27 }
 0x23f   : > { %v403_v30 = vrot.slane %v402_v29, 2 }
 0x241   : > { %v404_v31 = vadd.f32 %v403_v30, %v402_v29 }
 0x243   : > { %v405_v32 = vrot.slane %v404_v31, 1 }
 0x245   : > { %v406_v34 = vadd.f32 %v405_v32, %v404_v31 }
 0x247   : > { %v407_v35 = vadd.f32 %v406_v34, %v399_v33 }
 0x249   : > { %408 = vst [vmem:[#allocation3] sm:$0x1] %v407_v35 }
 0x2a9   : > { %v387_v36 = vpop.xlane.xlu0 %386 }
 0x2aa   : > { %v388_v37 = vrot.slane %v387_v36, 4 }
 0x2ac   : > { %v389_v38 = vadd.f32 %v388_v37, %v387_v36 }
 0x2ae   : > { %v390_v39 = vrot.slane %v389_v38, 2 }
 0x2b0   : > { %v391_v40 = vadd.f32 %v390_v39, %v389_v38 }
 0x2b2   : > { %v392_v41 = vrot.slane %v391_v40, 1 }
 0x2b4   : > { %v393_v42 = vadd.f32 %v392_v41, %v391_v40 }
 0x2b6   : > { %537 = vpush %v393_v42 }
 0x2e7   : > { %s538_s18 = spop %537  ;;  %412 = sbr.rel (%p524_p5) target bundleno = 947 (0x3b3), region = 44 }
 0x2e8   : > { %v395_v44 = vstv %s538_s18 }
 0x2e9   : > { %v396_v45 = vsub.f32 %v380_v43, %v395_v44 }
 0x2eb   : > { %398 = vst.msk [vmem:[#allocation2] sm:$0x1] %vm397_vm0, %v396_v45 }
 0x2ec   : > { %v413_v46 = vld [vmem:[#allocation3] sm:$0x1]  ;;  %v417_v49 = vld [vmem:[%s714_s3] sm:$0x1]  ;;  %vm420_vm1 = vcmask 1040384  }
 0x2ed   : > { %v414_v47 = vmul.f32 0.015625, %v413_v46 }
 0x2ef   : > { %573 = vlog2.f32 %v414_v47 }
 0x2f2   : > { %v431_v61 = vld [vmem:[#allocation2] sm:$0x1] }
 0x2f3   : > { %v432_v62 = vmul.f32 0.015625, %v431_v61 }
 0x2f5   : > { %v574_v48 = vpop.eup %573 }
 0x2f6   : > { %v416_v50 = vmul.f32 0.6931472, %v574_v48 }
 0x2f8   : > { %v418_v51 = vsub.f32 %v416_v50, %v417_v49 }
 0x2fa   : > { %v419_v52 = vmul.f32 %v418_v51, %v414_v47 }
 0x2fc   : > { %v421_v53 = vsel %vm420_vm1, %v419_v52, 0.0 }
 0x2fd   : > { %422 = vadd.xlane.f32.xlu0 %v421_v53 }
 0x370   : > { %v423_v54 = vpop.xlane.xlu0 %422 }
 0x371   : > { %v424_v55 = vrot.slane %v423_v54, 4 }
 0x373   : > { %v425_v56 = vadd.f32 %v424_v55, %v423_v54 }
 0x375   : > { %v426_v57 = vrot.slane %v425_v56, 2 }
 0x377   : > { %v427_v58 = vadd.f32 %v426_v57, %v425_v56 }
 0x379   : > { %v428_v59 = vrot.slane %v427_v58, 1 }
 0x37b   : > { %v429_v60 = vadd.f32 %v428_v59, %v427_v58 }
 0x37d   : > { %539 = vpush %v429_v60 }
 0x3ae   : > { %s540_s21 = spop %539 }
 0x3af   : > { %v433_v63 = vstv %s540_s21 }
 0x3b0   : > { %v434_v0 = vadd.f32 %v433_v63, %v432_v62 }
 0x3b2   : > { %435 = vst.msk [vmem:[#allocation4] sm:$0x1] %vm397_vm0, %v434_v0 }
 0x3b3 PF: > { %p545_p6 = scmp.eq.s32.totalorder %s648_s16, 3  ;;  %s616_s22 = smov [#allocation4]  }
 0x3b4   : > { %s442_s23 = sshll.u32 %s616_s22, 4  ;;  %s444_s26 = sshll.u32 %s715_s4, 4  ;;  %s443_s23 = int_to_ptr.vmem [resolvable:$true] %s442_s23  ;;  %s445_s26 = int_to_ptr.hbm [resolvable:$true] %s444_s26 }
 0x3b5   : > { %542 = dma.vmem_to_hbm [thread:$0]  (%p545_p6), %s443_s23, 16, %s445_s26, [#allocation5]  }
 0x3b6   : > { %608 = dma.done.wait (%p545_p6), [#allocation5], 16  }
 0x3b7   : > { %610 = vsyncadd (%p545_p6), [#allocation5], 4294967280 }
 0x3b8 PF: > { %s15_s15 = sadd.s32 1, %s613_s15  }
 0x3b9   : > { %p12_p7 = scmp.ge.s32.totalorder %s15_s15, 6  }
 0x3bb   :  { %14 = sbr.rel (!%p12_p7) target bundleno = 1 (0x1), region = 71 }
 0x3c0   :  { %458 = vsyncpa [#allocation5], 1 }
 0x3c1   :  { %460 = vsyncpa [#allocation5 + $0x1], 1 }

// kernel: pmsn_loss.2
= control target key start
LH: loop header
LB: loop body
LE: loop exit
PB: predicated region body
PF: predicated region fallthrough
CT: control target
= control target key end

     0   :  { %vm33_vm0 = vcmask 523264   ;;  %vm339_vm5 = vcmask 519168   ;;  %s1367_s1 = inlined_call_operand.vmem [shape: f32[128,64], index: 1, kind: input, shape index: {}]   ;;  %s1368_s0 = inlined_call_operand.vmem [shape: f32[16,64], index: 0, kind: input, shape index: {}]   ;;  %s1369_s3 = inlined_call_operand.vmem [shape: bf16[128,64], index: 3, kind: output, shape index: {1}]   ;;  %s1370_s2 = inlined_call_operand.vmem [shape: f32[16,128], index: 2, kind: output, shape index: {0}]  }
   0x1   :  { %v792_v0 = vld [vmem:[%s1367_s1 + $0x70] sm:$0xff]  ;;  %v797_v1 = vld [vmem:[%s1367_s1 + $0x60] sm:$0xff]  ;;  %v813_v6 = vld [vmem:[%s1367_s1 + $0x78] sm:$0xff] }
   0x2   :  { %v802_v2 = vld [vmem:[%s1367_s1 + $0x50] sm:$0xff]  ;;  %v76_v3 = vmul.f32 %v792_v0, %v792_v0  ;;  %v74_v4 = vmul.f32 %v797_v1, %v797_v1  ;;  %v818_v7 = vld [vmem:[%s1367_s1 + $0x68] sm:$0xff]  ;;  %v826_v11 = vld [vmem:[%s1367_s1 + $0x58] sm:$0xff]  ;;  %v77_v12 = vmul.f32 %v813_v6, %v813_v6 }
   0x3   :  { %v72_v5 = vmul.f32 %v802_v2, %v802_v2  ;;  %v75_v13 = vmul.f32 %v818_v7, %v818_v7  ;;  %v73_v14 = vmul.f32 %v826_v11, %v826_v11  ;;  %v840_v18 = vld [vmem:[%s1367_s1 + $0x48] sm:$0xff]  ;;  %v845_v19 = vld [vmem:[%s1367_s1 + $0x40] sm:$0xff]  ;;  %v850_v20 = vld [vmem:[%s1367_s1 + $0x30] sm:$0xff] }
   0x4   :  { %v120_v8 = vsel %vm33_vm0, %v76_v3, 0.0  ;;  %v114_v9 = vsel %vm33_vm0, %v74_v4, 0.0  ;;  %v123_v15 = vsel %vm33_vm0, %v77_v12, 0.0  ;;  %v71_v21 = vmul.f32 %v840_v18, %v840_v18  ;;  %v863_v26 = vld [vmem:[%s1367_s1 + $0x38] sm:$0xff]  ;;  %v869_v28 = vld [vmem:[%s1367_s1 + $0x20] sm:$0xff]  ;;  %v874_v29 = vld [vmem:[%s1367_s1 + $0x28] sm:$0xff] }
   0x5   :  { %v108_v10 = vsel %vm33_vm0, %v72_v5, 0.0  ;;  %121 = vadd.xlane.f32.xlu0 %v120_v8  ;;  %115 = vadd.xlane.f32.xlu1 %v114_v9  ;;  %v117_v16 = vsel %vm33_vm0, %v75_v13, 0.0  ;;  %v111_v17 = vsel %vm33_vm0, %v73_v14, 0.0  ;;  %v70_v22 = vmul.f32 %v845_v19, %v845_v19  ;;  %v888_v36 = vld [vmem:[%s1367_s1 + $0x18] sm:$0xff]  ;;  %v893_v37 = vld [vmem:[%s1367_s1 + $0x10] sm:$0xff]  ;;  %v898_v38 = vld [vmem:[%s1367_s1] sm:$0xff] }
   0x6   :  { %109 = vadd.xlane.f32.xlu2 %v108_v10  ;;  %v68_v23 = vmul.f32 %v850_v20, %v850_v20  ;;  %v105_v24 = vsel %vm33_vm0, %v71_v21, 0.0  ;;  %v69_v30 = vmul.f32 %v863_v26, %v863_v26  ;;  %v66_v31 = vmul.f32 %v869_v28, %v869_v28  ;;  %v911_v44 = vld [vmem:[%s1367_s1 + $0x8] sm:$0xff]  ;;  %v917_v46 = vld [vmem:[%s1368_s0] sm:$0xff] }
   0x7   :  { %v102_v25 = vsel %vm33_vm0, %v70_v22, 0.0  ;;  %v67_v32 = vmul.f32 %v874_v29, %v874_v29  ;;  %v65_v39 = vmul.f32 %v888_v36, %v888_v36  ;;  %v64_v40 = vmul.f32 %v893_v37, %v893_v37  ;;  %v922_v47 = vld [vmem:[%s1368_s0 + $0x8] sm:$0xff] }
   0x8   :  { %v96_v27 = vsel %vm33_vm0, %v68_v23, 0.0  ;;  %v99_v33 = vsel %vm33_vm0, %v69_v30, 0.0  ;;  %v90_v34 = vsel %vm33_vm0, %v66_v31, 0.0  ;;  %v62_v41 = vmul.f32 %v898_v38, %v898_v38 }
   0x9   :  { %v93_v35 = vsel %vm33_vm0, %v67_v32, 0.0  ;;  %v87_v42 = vsel %vm33_vm0, %v65_v39, 0.0  ;;  %v84_v43 = vsel %vm33_vm0, %v64_v40, 0.0  ;;  %v63_v48 = vmul.f32 %v911_v44, %v911_v44 }
   0xa   :  { %v78_v45 = vsel %vm33_vm0, %v62_v41, 0.0  ;;  %v31_v49 = vmul.f32 %v917_v46, %v917_v46  ;;  %v32_v50 = vmul.f32 %v922_v47, %v922_v47 }
   0xb   :  { %v81_v51 = vsel %vm33_vm0, %v63_v48, 0.0 }
   0xc   :  { %v34_v52 = vsel %vm33_vm0, %v31_v49, 0.0  ;;  %v37_v53 = vsel %vm33_vm0, %v32_v50, 0.0 }
   0xd   :  { %124 = vadd.xlane.f32.xlu0 %v123_v15  ;;  %118 = vadd.xlane.f32.xlu1 %v117_v16 }
   0xe   :  { %112 = vadd.xlane.f32.xlu2 %v111_v17 }
  0x15   :  { %106 = vadd.xlane.f32.xlu1 %v105_v24  ;;  %103 = vadd.xlane.f32.xlu0 %v102_v25 }
  0x16   :  { %97 = vadd.xlane.f32.xlu2 %v96_v27 }
  0x1d   :  { %100 = vadd.xlane.f32.xlu0 %v99_v33  ;;  %91 = vadd.xlane.f32.xlu1 %v90_v34 }
  0x1e   :  { %94 = vadd.xlane.f32.xlu2 %v93_v35 }
  0x25   :  { %88 = vadd.xlane.f32.xlu1 %v87_v42  ;;  %85 = vadd.xlane.f32.xlu0 %v84_v43 }
  0x26   :  { %79 = vadd.xlane.f32.xlu2 %v78_v45 }
  0x2d   :  { %82 = vadd.xlane.f32.xlu0 %v81_v51  ;;  %35 = vadd.xlane.f32.xlu1 %v34_v52 }
  0x2e   :  { %38 = vadd.xlane.f32.xlu2 %v37_v53 }
  0x78   :  { %v122_v54 = vpop.xlane.xlu0 %121  ;;  %v116_v55 = vpop.xlane.xlu1 %115 }
  0x79   :  { %v140_v56 = vmax.f32 %v122_v54, 1e-24  ;;  %v933_v57 = vmax.f32 %v116_v55, 1e-24  ;;  %v110_v58 = vpop.xlane.xlu2 %109 }
  0x7a   :  { %v935_v59 = vmax.f32 %v110_v58, 1e-24 }
  0x7b   :  { %705 = vrsqrt.f32 %v140_v56  ;;  %vm288_vm2 = vweird.f32 %v140_v56  ;;  %vm268_vm4 = vweird.f32 %v933_v57 }
  0x7c   :  { %707 = vrsqrt.f32 %v933_v57  ;;  %vm248_vm13 = vweird.f32 %v935_v59 }
  0x7d   :  { %709 = vrsqrt.f32 %v935_v59 }
  0x80   :  { %v125_v60 = vpop.xlane.xlu0 %124  ;;  %v119_v61 = vpop.xlane.xlu1 %118 }
  0x81   :  { %v706_v62 = vpop.eup %705  ;;  %v939_v63 = vmax.f32 %v125_v60, 1e-24  ;;  %v941_v3 = vmax.f32 %v119_v61, 1e-24  ;;  %v113_v4 = vpop.xlane.xlu2 %112 }
  0x82   :  { %v943_v5 = vpop.eup %707  ;;  %v283_v8 = vmul.f32 %v706_v62, %v140_v56  ;;  %v945_v9 = vmax.f32 %v113_v4, 1e-24  ;;  %vm289_vm1 = vweird.f32 %v706_v62 }
  0x83   :  { %711 = vrsqrt.f32 %v939_v63  ;;  %v263_v12 = vmul.f32 %v943_v5, %v933_v57  ;;  %v951_v13 = vpop.eup %709  ;;  %vm290_vm3 = vmor %vm288_vm2, %vm289_vm1  ;;  %vm269_vm7 = vweird.f32 %v943_v5  ;;  %vm298_vm8 = vweird.f32 %v939_v63 }
  0x84   :  { %v284_v10 = vmul.f32 %v706_v62, %v283_v8  ;;  %713 = vrsqrt.f32 %v941_v3  ;;  %v243_v17 = vmul.f32 %v951_v13, %v935_v59  ;;  %vm278_vm10 = vweird.f32 %v941_v3  ;;  %vm1024_vm12 = vmor %vm268_vm4, %vm269_vm7 }
  0x85   :  { %715 = vrsqrt.f32 %v945_v9  ;;  %v264_v16 = vmul.f32 %v943_v5, %v263_v12  ;;  %vm249_vm14 = vweird.f32 %v951_v13  ;;  %vm258_vm15 = vweird.f32 %v945_v9 }
  0x86   :  { %v285_v14 = vmul.f32 0.5, %v284_v10  ;;  %v244_v39 = vmul.f32 %v951_v13, %v243_v17 }
  0x87   :  { %v265_v35 = vmul.f32 0.5, %v264_v16 }
  0x88   :  { %v286_v15 = vsub.f32 1.5, %v285_v14  ;;  %v107_v21 = vpop.xlane.xlu1 %106  ;;  %v104_v22 = vpop.xlane.xlu0 %103  ;;  %v245_v52 = vmul.f32 0.5, %v244_v39 }
  0x89   :  { %v957_v23 = vpop.eup %711  ;;  %v959_v24 = vmax.f32 %v107_v21, 1e-24  ;;  %v961_v25 = vmax.f32 %v104_v22, 1e-24  ;;  %v98_v27 = vpop.xlane.xlu2 %97  ;;  %v266_v51 = vsub.f32 1.5, %v265_v35 }
  0x8a   :  { %v963_v30 = vpop.eup %713  ;;  %v287_v31 = vmul.f32 %v706_v62, %v286_v15  ;;  %v293_v32 = vmul.f32 %v957_v23, %v939_v63  ;;  %v978_v45 = vmax.f32 %v98_v27, 1e-24  ;;  %vm299_vm6 = vweird.f32 %v957_v23 }
  0x8b   :  { %v967_v33 = vpop.eup %715  ;;  %v273_v34 = vmul.f32 %v963_v30, %v941_v3  ;;  %717 = vrsqrt.f32 %v959_v24  ;;  %v267_v15 = vmul.f32 %v943_v5, %v266_v51  ;;  %v246_v16 = vsub.f32 1.5, %v245_v52  ;;  %vm300_vm9 = vmor %vm298_vm8, %vm299_vm6 }
  0x8c   :  { %v294_v40 = vmul.f32 %v957_v23, %v293_v32  ;;  %719 = vrsqrt.f32 %v961_v25  ;;  %v253_v43 = vmul.f32 %v967_v33, %v945_v9  ;;  %v291_v48 = vsel %vm290_vm3, %v706_v62, %v287_v31  ;;  %vm1058_vm3 = vmor %vm248_vm13, %vm249_vm14 }
  0x8d   :  { %v274_v41 = vmul.f32 %v963_v30, %v273_v34  ;;  %v321_v50 = vmul.f32 %v291_v48, %v792_v0  ;;  %721 = vrsqrt.f32 %v978_v45  ;;  %vm279_vm11 = vweird.f32 %v963_v30 }
  0x8e   :  { %v295_v42 = vmul.f32 0.5, %v294_v40  ;;  %v254_v0 = vmul.f32 %v967_v33, %v253_v43  ;;  %vm1038_vm1 = vmor %vm278_vm10, %vm279_vm11  ;;  %vm259_vm2 = vweird.f32 %v967_v33  ;;  %vm228_vm4 = vweird.f32 %v961_v25 }
  0x8f   :  { %v275_v49 = vmul.f32 0.5, %v274_v41  ;;  %v337_v62 = vpack.c.bf16 %v321_v50, %v321_v50  ;;  %v271_v41 = vsel %vm1024_vm12, %v943_v5, %v267_v15  ;;  %vm238_vm6 = vweird.f32 %v959_v24 }
  0x90   :  { %v296_v53 = vsub.f32 1.5, %v295_v42  ;;  %v101_v54 = vpop.xlane.xlu0 %100  ;;  %v92_v55 = vpop.xlane.xlu1 %91  ;;  %v255_v27 = vmul.f32 0.5, %v254_v0  ;;  %vm208_vm7 = vweird.f32 %v978_v45 }
  0x91   :  { %v983_v56 = vpop.eup %717  ;;  %v276_v58 = vsub.f32 1.5, %v275_v49  ;;  %v986_v60 = vmax.f32 %v101_v54, 1e-24  ;;  %v95_v61 = vpop.xlane.xlu2 %94  ;;  %v992_v10 = vmax.f32 %v92_v55, 1e-24  ;;  %v319_v54 = vmul.f32 %v271_v41, %v797_v1 }
  0x92   :  { %v297_v4 = vmul.f32 %v957_v23, %v296_v53  ;;  %v233_v8 = vmul.f32 %v983_v56, %v959_v24  ;;  %v994_v12 = vpop.eup %719  ;;  %v999_v14 = vmax.f32 %v95_v61, 1e-24  ;;  %354 = vst.msk [vmem:[%s1369_s3 + $0x38] sm:$0xf] %vm339_vm5, %v337_v62  ;;  %v256_v50 = vsub.f32 1.5, %v255_v27 }
  0x93   :  { %723 = vrsqrt.f32 %v986_v60  ;;  %v277_v63 = vmul.f32 %v963_v30, %v276_v58  ;;  %v223_v17 = vmul.f32 %v994_v12, %v961_v25  ;;  %v1015_v22 = vpop.eup %721  ;;  %vm239_vm8 = vweird.f32 %v983_v56 }
  0x94   :  { %725 = vrsqrt.f32 %v999_v14  ;;  %v301_v21 = vsel %vm300_vm9, %v957_v23, %v297_v4  ;;  %v234_v31 = vmul.f32 %v983_v56, %v233_v8  ;;  %v1032_v23 = vmul.f32 %v951_v13, %v246_v16  ;;  %vm1099_vm9 = vmor %vm258_vm15, %vm259_vm2 }
  0x95   :  { %727 = vrsqrt.f32 %v992_v10  ;;  %v322_v32 = vmul.f32 %v301_v21, %v813_v6  ;;  %v203_v57 = vmul.f32 %v1015_v22, %v978_v45  ;;  %v224_v3 = vmul.f32 %v994_v12, %v223_v17 }
  0x96   :  { %v281_v48 = vsel %vm1038_vm1, %v963_v30, %v277_v63  ;;  %v235_v5 = vmul.f32 0.5, %v234_v31  ;;  %v386_v30 = vunpack.c.l.b16 %v337_v62  ;;  %v251_v1 = vsel %vm1058_vm3, %v951_v13, %v1032_v23 }
  0x97   :  { %v338_v35 = vpack.c.bf16 %v322_v32, %v322_v32  ;;  %v204_v58 = vmul.f32 %v1015_v22, %v203_v57  ;;  %v320_v4 = vmul.f32 %v281_v48, %v818_v7  ;;  %v225_v0 = vmul.f32 0.5, %v224_v3 }
  0x98   :  { %v89_v39 = vpop.xlane.xlu1 %88  ;;  %v86_v40 = vpop.xlane.xlu0 %85  ;;  %v236_v16 = vsub.f32 1.5, %v235_v5  ;;  %v257_v17 = vmul.f32 %v967_v33, %v256_v50  ;;  %v335_v27 = vpack.c.bf16 %v319_v54, %v319_v54  ;;  %vm229_vm10 = vweird.f32 %v994_v12 }
  0x99   :  { %v1047_v42 = vpop.eup %723  ;;  %v1051_v43 = vmax.f32 %v89_v39, 1e-24  ;;  %355 = vst.msk [vmem:[%s1369_s3 + $0x3c] sm:$0xf] %vm339_vm5, %v338_v35  ;;  %v1068_v52 = vmax.f32 %v86_v40, 1e-24  ;;  %v387_v59 = vunpack.c.l.b16 %v338_v35  ;;  %v80_v15 = vpop.xlane.xlu2 %79  ;;  %vm218_vm11 = vweird.f32 %v986_v60  ;;  %vm1143_vm15 = vmor %vm228_vm4, %vm229_vm10 }
  0x9a   :  { %v213_v51 = vmul.f32 %v1047_v42, %v986_v60  ;;  %v1070_v53 = vpop.eup %725  ;;  %v205_v31 = vmul.f32 0.5, %v204_v58  ;;  %v336_v32 = vpack.c.bf16 %v320_v4, %v320_v4  ;;  %v1105_v23 = vmax.f32 %v80_v15, 1e-24  ;;  %352 = vst.msk [vmem:[%s1369_s3 + $0x30] sm:$0xf] %vm339_vm5, %v335_v27  ;;  %vm1159_vm4 = vmor %vm238_vm6, %vm239_vm8 }
  0x9b   :  { %729 = vrsqrt.f32 %v1051_v43  ;;  %v1074_v55 = vpop.eup %727  ;;  %v193_v61 = vmul.f32 %v1070_v53, %v999_v14  ;;  %v395_v8 = vpack.c.b16 %v387_v59, %v386_v30  ;;  %v226_v57 = vsub.f32 1.5, %v225_v0 }
  0x9c   :  { %v214_v62 = vmul.f32 %v1047_v42, %v213_v51  ;;  %v183_v7 = vmul.f32 %v1074_v55, %v992_v10  ;;  %731 = vrsqrt.f32 %v1068_v52  ;;  %vm209_vm12 = vweird.f32 %v1015_v22  ;;  %353 = vst.msk [vmem:[%s1369_s3 + $0x34] sm:$0xf] %vm339_vm5, %v336_v32 }
  0x9d   :  { %v194_v63 = vmul.f32 %v1070_v53, %v193_v61  ;;  %v421_v21 = vsel %vm33_vm0, %v395_v8, 0  ;;  %v1117_v39 = vmul.f32 %v983_v56, %v236_v16  ;;  %v384_v48 = vunpack.c.l.b16 %v335_v27 }
  0x9e   :  { %423 = vmatpush.bf16.xpose.msra.mxu0 %v421_v21  ;;  %v215_v35 = vmul.f32 0.5, %v214_v62  ;;  %v184_v41 = vmul.f32 %v1074_v55, %v183_v7  ;;  %v385_v49 = vunpack.c.l.b16 %v336_v32  ;;  %v261_v50 = vsel %vm1099_vm9, %v967_v33, %v257_v17  ;;  %vm1172_vm9 = vmor %vm208_vm7, %vm209_vm12 }
  0x9f   :  { %v195_v40 = vmul.f32 0.5, %v194_v63  ;;  %vm219_vm13 = vweird.f32 %v1047_v42  ;;  %v206_v51 = vsub.f32 1.5, %v205_v31  ;;  %v227_v59 = vmul.f32 %v994_v12, %v226_v57 }
  0xa0   :  { %v83_v34 = vpop.xlane.xlu0 %82  ;;  %v216_v54 = vsub.f32 1.5, %v215_v35  ;;  %vm188_vm14 = vweird.f32 %v992_v10  ;;  %v394_v61 = vpack.c.b16 %v385_v49, %v384_v48  ;;  %vm198_vm1 = vweird.f32 %v999_v14  ;;  %vm1196_vm8 = vmor %vm218_vm11, %vm219_vm13 }
  0xa1   :  { %v1107_v6 = vpop.eup %729  ;;  %v1114_v9 = vmax.f32 %v83_v34, 1e-24  ;;  %v196_v4 = vsub.f32 1.5, %v195_v40  ;;  %vm199_vm2 = vweird.f32 %v1070_v53  ;;  %v185_v0 = vmul.f32 0.5, %v184_v41 }
  0xa2   :  { %v173_v3 = vmul.f32 %v1107_v6, %v1051_v43  ;;  %v1130_v5 = vpop.eup %731  ;;  %v317_v62 = vmul.f32 %v251_v1, %v802_v2  ;;  %v318_v8 = vmul.f32 %v261_v50, %v826_v11  ;;  %vm189_vm3 = vweird.f32 %v1074_v55  ;;  %vm1245_vm13 = vmor %vm198_vm1, %vm199_vm2 }
  0xa3   :  { %733 = vrsqrt.f32 %v1114_v9  ;;  %v163_v58 = vmul.f32 %v1130_v5, %v1068_v52  ;;  %v418_v16 = vsel %vm33_vm0, %v394_v61, 0  ;;  %v207_v2 = vmul.f32 %v1015_v22, %v206_v51  ;;  %vm1228_vm12 = vmor %vm188_vm14, %vm189_vm3 }
  0xa4   :  { %v174_v30 = vmul.f32 %v1107_v6, %v173_v3  ;;  %735 = vrsqrt.f32 %v1105_v23  ;;  %vm168_vm10 = vweird.f32 %v1068_v52  ;;  %v333_v11 = vpack.c.bf16 %v317_v62, %v317_v62 }
  0xa5   :  { %v164_v25 = vmul.f32 %v1130_v5, %v163_v58  ;;  %v334_v1 = vpack.c.bf16 %v318_v8, %v318_v8  ;;  %v217_v17 = vmul.f32 %v1047_v42, %v216_v54  ;;  %vm179_vm6 = vweird.f32 %v1107_v6 }
  0xa6   :  { %v175_v15 = vmul.f32 0.5, %v174_v30  ;;  %424 = vmatpush.bf16.xpose.msra.mxu0 %v418_v16  ;;  %v231_v27 = vsel %vm1143_vm15, %v994_v12, %v227_v59  ;;  %v1183_v31 = vmul.f32 %v1070_v53, %v196_v4  ;;  %v186_v32 = vsub.f32 1.5, %v185_v0  ;;  %350 = vst.msk [vmem:[%s1369_s3 + $0x28] sm:$0xf] %vm339_vm5, %v333_v11  ;;  %v39_v30 = vpop.xlane.xlu2 %38  ;;  %v36_v59 = vpop.xlane.xlu1 %35 }
  0xa7   :  { %v165_v21 = vmul.f32 0.5, %v164_v25  ;;  %vm148_vm7 = vweird.f32 %v1105_v23  ;;  %351 = vst.msk [vmem:[%s1369_s3 + $0x2c] sm:$0xf] %vm339_vm5, %v334_v1  ;;  %v382_v35 = vunpack.c.l.b16 %v333_v11  ;;  %v383_v40 = vunpack.c.l.b16 %v334_v1 }
  0xa8   :  { %v176_v34 = vsub.f32 1.5, %v175_v15  ;;  %v241_v60 = vsel %vm1159_vm4, %v983_v56, %v1117_v39  ;;  %v315_v3 = vmul.f32 %v231_v27, %v845_v19  ;;  %v211_v48 = vsel %vm1172_vm9, %v1015_v22, %v207_v2 }
  0xa9   :  { %v1165_v7 = vpop.eup %733  ;;  %v166_v49 = vsub.f32 1.5, %v165_v21  ;;  %v393_v51 = vpack.c.b16 %v383_v40, %v382_v35  ;;  %v316_v54 = vmul.f32 %v241_v60, %v840_v18  ;;  %v221_v56 = vsel %vm1196_vm8, %v1047_v42, %v217_v17 }
  0xaa   :  { %v1180_v13 = vpop.eup %735  ;;  %v153_v45 = vmul.f32 %v1165_v7, %v1114_v9  ;;  %v331_v61 = vpack.c.bf16 %v315_v3, %v315_v3  ;;  %v313_v19 = vmul.f32 %v211_v48, %v850_v20  ;;  %v187_v39 = vmul.f32 %v1074_v55, %v186_v32 }
  0xab   :  { %v143_v57 = vmul.f32 %v1180_v13, %v1105_v23  ;;  %vm169_vm11 = vweird.f32 %v1130_v5  ;;  %v415_v33 = vsel %vm33_vm0, %v393_v51, 0  ;;  %v177_v4 = vmul.f32 %v1107_v6, %v176_v34 }
  0xac   :  { %v154_v41 = vmul.f32 %v1165_v7, %v153_v45  ;;  %v1233_v42 = vmax.f32 %v39_v30, 1e-24  ;;  %v1235_v20 = vmax.f32 %v36_v59, 1e-24  ;;  %v332_v0 = vpack.c.bf16 %v316_v54, %v316_v54  ;;  %348 = vst.msk [vmem:[%s1369_s3 + $0x20] sm:$0xf] %vm339_vm5, %v331_v61  ;;  %vm1268_vm2 = vmor %vm168_vm10, %vm169_vm11 }
  0xad   :  { %v144_v50 = vmul.f32 %v1180_v13, %v143_v57  ;;  %v380_v15 = vunpack.c.l.b16 %v331_v61  ;;  %v314_v25 = vmul.f32 %v221_v56, %v863_v26  ;;  %vm1391_vm14 = vweird.f32 %v1051_v43 }
  0xae   :  { %v155_v58 = vmul.f32 0.5, %v154_v41  ;;  %425 = vmatpush.bf16.xpose.msra.mxu0 %v415_v33  ;;  %vm1254_vm15 = vmor %vm1391_vm14, %vm179_vm6  ;;  %v167_v63 = vmul.f32 %v1130_v5, %v166_v49  ;;  %vm149_vm1 = vweird.f32 %v1180_v13  ;;  %349 = vst.msk [vmem:[%s1369_s3 + $0x24] sm:$0xf] %vm339_vm5, %v332_v0  ;;  %v381_v14 = vunpack.c.l.b16 %v332_v0 }
  0xaf   :  { %v145_v22 = vmul.f32 0.5, %v144_v50  ;;  %v329_v2 = vpack.c.bf16 %v313_v19, %v313_v19  ;;  %vm158_vm3 = vweird.f32 %v1114_v9  ;;  %vm159_vm9 = vweird.f32 %v1165_v7  ;;  %vm1292_vm4 = vmor %vm148_vm7, %vm149_vm1 }
  0xb0   :  { %v156_v62 = vsub.f32 1.5, %v155_v58  ;;  %v330_v43 = vpack.c.bf16 %v314_v25, %v314_v25  ;;  %v191_v11 = vsel %vm1228_vm12, %v1074_v55, %v187_v39  ;;  %737 = vrsqrt.f32 %v1233_v42  ;;  %vm1305_vm10 = vmor %vm158_vm3, %vm159_vm9 }
  0xb1   :  { %v146_v8 = vsub.f32 1.5, %v145_v22  ;;  %v392_v17 = vpack.c.b16 %v381_v14, %v380_v15  ;;  %346 = vst.msk [vmem:[%s1369_s3 + $0x18] sm:$0xf] %vm339_vm5, %v329_v2  ;;  %v201_v52 = vsel %vm1245_vm13, %v1070_v53, %v1183_v31  ;;  %739 = vrsqrt.f32 %v1235_v20 }
  0xb2   :  { %v157_v24 = vmul.f32 %v1165_v7, %v156_v62  ;;  %347 = vst.msk [vmem:[%s1369_s3 + $0x1c] sm:$0xf] %vm339_vm5, %v330_v43  ;;  %v311_v21 = vmul.f32 %v191_v11, %v869_v28  ;;  %v312_v53 = vmul.f32 %v201_v52, %v874_v29  ;;  %v378_v23 = vunpack.c.l.b16 %v329_v2 }
  0xb3   :  { %v147_v1 = vmul.f32 %v1180_v13, %v146_v8  ;;  %v171_v31 = vsel %vm1268_vm2, %v1130_v5, %v167_v63  ;;  %v181_v32 = vsel %vm1254_vm15, %v1107_v6, %v177_v4  ;;  %v412_v45 = vsel %vm33_vm0, %v392_v17, 0 }
  0xb4   :  { %v379_v28 = vunpack.c.l.b16 %v330_v43  ;;  %v327_v12 = vpack.c.bf16 %v311_v21, %v311_v21  ;;  %v328_v29 = vpack.c.bf16 %v312_v53, %v312_v53  ;;  %v309_v9 = vmul.f32 %v171_v31, %v893_v37 }
  0xb5   :  { %v310_v34 = vmul.f32 %v181_v32, %v888_v36  ;;  %v151_v57 = vsel %vm1292_vm4, %v1180_v13, %v147_v1  ;;  %v161_v6 = vsel %vm1305_vm10, %v1165_v7, %v157_v24  ;;  %vm58_vm6 = vweird.f32 %v1233_v42 }
  0xb6   :  { %426 = vmatpush.bf16.xpose.msra.mxu0 %v412_v45  ;;  %344 = vst.msk [vmem:[%s1369_s3 + $0x10] sm:$0xf] %vm339_vm5, %v327_v12  ;;  %v738_v5 = vpop.eup %737  ;;  %v325_v36 = vpack.c.bf16 %v309_v9, %v309_v9  ;;  %v307_v35 = vmul.f32 %v151_v57, %v898_v38  ;;  %v308_v13 = vmul.f32 %v161_v6, %v911_v44  ;;  %v376_v48 = vunpack.c.l.b16 %v327_v12 }
  0xb7   :  { %345 = vst.msk [vmem:[%s1369_s3 + $0x14] sm:$0xf] %vm339_vm5, %v328_v29  ;;  %v326_v37 = vpack.c.bf16 %v310_v34, %v310_v34  ;;  %v740_v40 = vpop.eup %739  ;;  %v391_v41 = vpack.c.b16 %v379_v28, %v378_v23  ;;  %v53_v3 = vmul.f32 %v738_v5, %v1233_v42  ;;  %v377_v49 = vunpack.c.l.b16 %v328_v29 }
  0xb8   :  { %342 = vst.msk [vmem:[%s1369_s3 + $0x8] sm:$0xf] %vm339_vm5, %v325_v36  ;;  %v323_v7 = vpack.c.bf16 %v307_v35, %v307_v35  ;;  %v324_v60 = vpack.c.bf16 %v308_v13, %v308_v13  ;;  %v43_v38 = vmul.f32 %v740_v40, %v1235_v20  ;;  %v374_v61 = vunpack.c.l.b16 %v325_v36 }
  0xb9   :  { %343 = vst.msk [vmem:[%s1369_s3 + $0xc] sm:$0xf] %vm339_vm5, %v326_v37  ;;  %v409_v44 = vsel %vm33_vm0, %v391_v41, 0  ;;  %v54_v50 = vmul.f32 %v738_v5, %v53_v3  ;;  %v390_v30 = vpack.c.b16 %v377_v49, %v376_v48  ;;  %v375_v56 = vunpack.c.l.b16 %v326_v37 }
  0xba   :  { %340 = vst.msk [vmem:[%s1369_s3] sm:$0xf] %vm339_vm5, %v323_v7  ;;  %v44_v51 = vmul.f32 %v740_v40, %v43_v38  ;;  %vm59_vm7 = vweird.f32 %v738_v5  ;;  %vm48_vm8 = vweird.f32 %v1235_v20  ;;  %v372_v0 = vunpack.c.l.b16 %v323_v7 }
  0xbb   :  { %341 = vst.msk [vmem:[%s1369_s3 + $0x4] sm:$0xf] %vm339_vm5, %v324_v60  ;;  %v55_v59 = vmul.f32 0.5, %v54_v50  ;;  %v406_v58 = vsel %vm33_vm0, %v390_v30, 0  ;;  %v389_v22 = vpack.c.b16 %v375_v56, %v374_v61  ;;  %vm49_vm5 = vweird.f32 %v740_v40  ;;  %vm60_vm11 = vmor %vm58_vm6, %vm59_vm7 }
  0xbc   :  { %v45_v54 = vmul.f32 0.5, %v44_v51  ;;  %vm50_vm12 = vmor %vm48_vm8, %vm49_vm5  ;;  %v373_v10 = vunpack.c.l.b16 %v324_v60 }
  0xbd   :  { %v56_v19 = vsub.f32 1.5, %v55_v59  ;;  %v403_v4 = vsel %vm33_vm0, %v389_v22, 0 }
  0xbe   :  { %427 = vmatpush.bf16.xpose.msra.mxu0 %v409_v44  ;;  %v46_v39 = vsub.f32 1.5, %v45_v54  ;;  %v388_v15 = vpack.c.b16 %v373_v10, %v372_v0 }
  0xbf   :  { %v57_v33 = vmul.f32 %v738_v5, %v56_v19 }
  0xc0   :  { %v47_v18 = vmul.f32 %v740_v40, %v46_v39  ;;  %v400_v42 = vsel %vm33_vm0, %v388_v15, 0 }
  0xc1   :  { %v61_v8 = vsel %vm60_vm11, %v738_v5, %v57_v33 }
  0xc2   :  { %v51_v62 = vsel %vm50_vm12, %v740_v40, %v47_v18  ;;  %v303_v16 = vmul.f32 40.0, %v61_v8 }
  0xc3   :  { %v302_v25 = vmul.f32 40.0, %v51_v62 }
  0xc4   :  { %v305_v63 = vmul.f32 %v303_v16, %v922_v47 }
  0xc5   :  { %v304_v20 = vmul.f32 %v302_v25, %v917_v46 }
  0xc6   :  { %428 = vmatpush.bf16.xpose.msra.mxu0 %v406_v58 }
  0xc7   :  { %v306_v14 = vpack.c.bf16 %v305_v63, %v304_v20 }
  0xce   :  { %429 = vmatpush.bf16.xpose.msra.mxu0 %v403_v4 }
  0xd6   :  { %430 = vmatpush.bf16.xpose.msra.mxu0 %v400_v42 }
  0xdd   :  { %700 = vmatmul.msk.bf16.vlgmr.msra.gmra.mxu0 %vm33_vm0, %v306_v14 }
 0x15a   :  { %v432_v2 = vpop.f32.mrf.mxu0 }
 0x15b   :  { %437 = vmax.xlane.f32.xlu0 %v432_v2 }
 0x162   :  { %v434_v26 = vpop.f32.mrf.mxu0 }
 0x163   :  { %439 = vmax.xlane.f32.xlu1 %v434_v26 }
 0x1ce   :  { %v438_v43 = vpop.xlane.xlu0 %437 }
 0x1cf   :  { %v441_v11 = vsub.f32 %v432_v2, %v438_v43 }
 0x1d1   :  { %v443_v1 = vmul.f32 1.442695, %v441_v11 }
 0x1d3   :  { %741 = vpow2.f32 %v443_v1 }
 0x1d6   :  { %v440_v17 = vpop.xlane.xlu1 %439 }
 0x1d7   :  { %v442_v52 = vsub.f32 %v434_v26, %v440_v17 }
 0x1d9   :  { %v742_v24 = vpop.eup %741  ;;  %v445_v55 = vmul.f32 1.442695, %v442_v52 }
 0x1da   :  { %447 = vadd.xlane.f32.xlu2 %v742_v24 }
 0x1db   :  { %743 = vpow2.f32 %v445_v55 }
 0x1e1   :  { %v744_v46 = vpop.eup %743 }
 0x1e2   :  { %449 = vadd.xlane.f32.xlu0 %v744_v46 }
 0x24d   :  { %v448_v47 = vpop.xlane.xlu2 %447 }
 0x24e   :  { %745 = vrcp.f32 %v448_v47  ;;  %v462_v12 = vand.u32 2147483648, %v448_v47  ;;  %vm456_vm13 = vweird.f32 %v448_v47  ;;  %v460_v9 = vand.u32 2147483647, %v448_v47 }
 0x250   :  { %v463_v36 = vor.u32 1.1754944e-38, %v462_v12  ;;  %vm461_vm2 = vcmp.eq.f32.partialorder %v460_v9, 8.507059e+37 }
 0x254   :  { %v746_v21 = vpop.eup %745 }
 0x255   :  { %v452_v53 = vmul.f32 %v746_v21, %v448_v47  ;;  %v450_v27 = vpop.xlane.xlu0 %449  ;;  %vm457_vm0 = vweird.f32 %v746_v21 }
 0x256   :  { %747 = vrcp.f32 %v450_v27  ;;  %v477_v34 = vand.u32 2147483648, %v450_v27  ;;  %vm458_vm14 = vmor %vm456_vm13, %vm457_vm0  ;;  %v475_v5 = vand.u32 2147483647, %v450_v27  ;;  %vm471_vm1 = vweird.f32 %v450_v27 }
 0x257   :  { %v453_v23 = vsub.f32 1.0, %v452_v53 }
 0x258   :  { %v478_v13 = vor.u32 1.1754944e-38, %v477_v34  ;;  %vm476_vm9 = vcmp.eq.f32.partialorder %v475_v5, 8.507059e+37 }
 0x259   :  { %v454_v31 = vmul.f32 %v746_v21, %v453_v23 }
 0x25b   :  { %v455_v28 = vadd.f32 %v746_v21, %v454_v31 }
 0x25c   :  { %v748_v32 = vpop.eup %747 }
 0x25d   :  { %v467_v45 = vmul.f32 %v748_v32, %v450_v27  ;;  %v459_v6 = vsel %vm458_vm14, %v746_v21, %v455_v28  ;;  %vm472_vm15 = vweird.f32 %v748_v32 }
 0x25e   :  { %v464_v35 = vsel %vm461_vm2, %v463_v36, %v459_v6  ;;  %vm473_vm3 = vmor %vm471_vm1, %vm472_vm15 }
 0x25f   :  { %v468_v29 = vsub.f32 1.0, %v467_v45  ;;  %v481_v7 = vmul.f32 %v742_v24, %v464_v35 }
 0x261   :  { %v469_v57 = vmul.f32 %v748_v32, %v468_v29 }
 0x263   :  { %v470_v37 = vadd.f32 %v748_v32, %v469_v57 }
 0x265   :  { %v474_v40 = vsel %vm473_vm3, %v748_v32, %v470_v37 }
 0x266   :  { %v479_v41 = vsel %vm476_vm9, %v478_v13, %v474_v40 }
 0x267   :  { %v482_v60 = vmul.f32 %v744_v46, %v479_v41 }
 0x269   :  { %v483_v3 = vadd.f32 %v482_v60, %v481_v7 }
 0x26b   :  { %484 = vadd.xlane.f32.xlu1 %v483_v3 }
 0x2de   :  { %v485_v38 = vpop.xlane.xlu1 %484 }
 0x2df   :  { %v486_v44 = vrot.slane %v485_v38, 4 }
 0x2e1   :  { %v487_v48 = vadd.f32 %v486_v44, %v485_v38 }
 0x2e3   :  { %v488_v49 = vrot.slane %v487_v48, 2 }
 0x2e5   :  { %v489_v50 = vadd.f32 %v488_v49, %v487_v48 }
 0x2e7   :  { %v490_v51 = vrot.slane %v489_v50, 1 }
 0x2e9   :  { %v491_v30 = vadd.f32 %v490_v51, %v489_v50 }
 0x2eb   :  { %701 = vpush %v491_v30 }
 0x31c   :  { %s702_s3 = spop %701 }
 0x31d   :  { %v493_v59 = vstv %s702_s3 }
 0x31e   :  { %749 = vrcp.f32 %v493_v59  ;;  %v505_v56 = vand.u32 2147483648, %v493_v59  ;;  %v503_v39 = vand.u32 2147483647, %v493_v59  ;;  %vm499_vm10 = vweird.f32 %v493_v59 }
 0x320   :  { %v506_v33 = vor.u32 1.1754944e-38, %v505_v56  ;;  %vm504_vm7 = vcmp.eq.f32.partialorder %v503_v39, 8.507059e+37 }
 0x324   :  { %v750_v54 = vpop.eup %749 }
 0x325   :  { %v495_v58 = vmul.f32 %v750_v54, %v493_v59  ;;  %vm500_vm4 = vweird.f32 %v750_v54 }
 0x326   :  { %vm501_vm6 = vmor %vm499_vm10, %vm500_vm4 }
 0x327   :  { %v496_v61 = vsub.f32 1.0, %v495_v58 }
 0x329   :  { %v497_v19 = vmul.f32 %v750_v54, %v496_v61 }
 0x32b   :  { %v498_v22 = vadd.f32 %v750_v54, %v497_v19 }
 0x32d   :  { %v502_v18 = vsel %vm501_vm6, %v750_v54, %v498_v22 }
 0x32e   :  { %v507_v4 = vsel %vm504_vm7, %v506_v33, %v502_v18 }
 0x32f   :  { %703 = vpush %v507_v4 }
 0x360   :  { %s704_s22 = spop %703 }
 0x361   :  { %v509_v0 = vstv %s704_s22 }
 0x362   :  { %v510_v10 = vmul.f32 %v509_v0, %v481_v7  ;;  %v511_v62 = vmul.f32 %v509_v0, %v482_v60 }
 0x364   :  { %v512_v8 = vadd.f32 %v511_v62, %v510_v10 }
 0x366   :  { %v513_v15 = vrot.slane %v512_v8, 4 }
 0x368   :  { %v514_v25 = vadd.f32 %v513_v15, %v512_v8 }
 0x36a   :  { %v515_v16 = vrot.slane %v514_v25, 2 }
 0x36c   :  { %v516_v42 = vadd.f32 %v515_v16, %v514_v25 }
 0x36e   :  { %v517_v20 = vrot.slane %v516_v42, 1 }
 0x370   :  { %v518_v63 = vadd.f32 %v517_v20, %v516_v42 }
 0x372   :  { %751 = vrcp.f32 %v518_v63  ;;  %v530_v43 = vand.u32 2147483648, %v518_v63  ;;  %v528_v1 = vand.u32 2147483647, %v518_v63  ;;  %vm524_vm5 = vweird.f32 %v518_v63 }
 0x374   :  { %v531_v52 = vor.u32 1.1754944e-38, %v530_v43  ;;  %vm529_vm12 = vcmp.eq.f32.partialorder %v528_v1, 8.507059e+37 }
 0x378   :  { %v752_v14 = vpop.eup %751 }
 0x379   :  { %v520_v2 = vmul.f32 %v752_v14, %v518_v63  ;;  %vm525_vm8 = vweird.f32 %v752_v14 }
 0x37a   :  { %vm526_vm11 = vmor %vm524_vm5, %vm525_vm8 }
 0x37b   :  { %v521_v26 = vsub.f32 1.0, %v520_v2 }
 0x37d   :  { %v522_v11 = vmul.f32 %v752_v14, %v521_v26 }
 0x37f   :  { %v523_v17 = vadd.f32 %v752_v14, %v522_v11 }
 0x381   :  { %v527_v24 = vsel %vm526_vm11, %v752_v14, %v523_v17 }
 0x382   :  { %v532_v55 = vsel %vm529_vm12, %v531_v52, %v527_v24 }
 0x383   :  { %v533_v46 = vmul.f32 0.0078125, %v532_v55 }
 0x385   :  { %v535_v47 = vmul.f32 %v533_v46, %v511_v62  ;;  %v534_v21 = vmul.f32 %v533_v46, %v510_v10 }
 0x387   :  { %538 = vadd.xlane.f32.xlu0 %v535_v47  ;;  %536 = vadd.xlane.f32.xlu2 %v534_v21 }
 0x3fa   :  { %v539_v53 = vpop.xlane.xlu0 %538  ;;  %v537_v27 = vpop.xlane.xlu2 %536 }
 0x3fb   :  { %753 = vrcp.f32 %v539_v53  ;;  %v566_v12 = vand.u32 2147483648, %v539_v53  ;;  %v551_v34 = vand.u32 2147483648, %v537_v27  ;;  %v564_v57 = vand.u32 2147483647, %v539_v53 }
 0x3fc   :  { %755 = vrcp.f32 %v537_v27  ;;  %v549_v5 = vand.u32 2147483647, %v537_v27  ;;  %vm560_vm14 = vweird.f32 %v539_v53  ;;  %vm545_vm1 = vweird.f32 %v537_v27 }
 0x3fd   :  { %v567_v37 = vor.u32 1.1754944e-38, %v566_v12  ;;  %v552_v13 = vor.u32 1.1754944e-38, %v551_v34  ;;  %vm565_vm3 = vcmp.eq.f32.partialorder %v564_v57, 8.507059e+37 }
 0x3fe   :  { %vm550_vm9 = vcmp.eq.f32.partialorder %v549_v5, 8.507059e+37 }
 0x401   :  { %v754_v23 = vpop.eup %753 }
 0x402   :  { %v756_v31 = vpop.eup %755  ;;  %v556_v32 = vmul.f32 %v754_v23, %v539_v53  ;;  %vm561_vm0 = vweird.f32 %v754_v23 }
 0x403   :  { %v541_v45 = vmul.f32 %v756_v31, %v537_v27  ;;  %vm546_vm13 = vweird.f32 %v756_v31  ;;  %vm562_vm15 = vmor %vm560_vm14, %vm561_vm0 }
 0x404   :  { %v557_v28 = vsub.f32 1.0, %v556_v32  ;;  %vm547_vm2 = vmor %vm545_vm1, %vm546_vm13 }
 0x405   :  { %v542_v29 = vsub.f32 1.0, %v541_v45 }
 0x406   :  { %v558_v9 = vmul.f32 %v754_v23, %v557_v28 }
 0x407   :  { %v543_v6 = vmul.f32 %v756_v31, %v542_v29 }
 0x408   :  { %v559_v36 = vadd.f32 %v754_v23, %v558_v9 }
 0x409   :  { %v544_v35 = vadd.f32 %v756_v31, %v543_v6 }
 0x40a   :  { %v563_v40 = vsel %vm562_vm15, %v754_v23, %v559_v36 }
 0x40b   :  { %v548_v41 = vsel %vm547_vm2, %v756_v31, %v544_v35  ;;  %v568_v7 = vsel %vm565_vm3, %v567_v37, %v563_v40 }
 0x40c   :  { %v553_v60 = vsel %vm550_vm9, %v552_v13, %v548_v41  ;;  %v569_v3 = vmul.f32 0.0625, %v568_v7 }
 0x40d   :  { %v554_v38 = vmul.f32 0.0625, %v553_v60 }
 0x40e   :  { %v571_v44 = vmul.f32 %v569_v3, %v535_v47 }
 0x40f   :  { %v570_v48 = vmul.f32 %v554_v38, %v534_v21 }
 0x411   :  { %v572_v49 = vadd.f32 %v571_v44, %v570_v48 }
 0x413   :  { %v573_v50 = vrot.slane %v572_v49, 4 }
 0x415   :  { %v574_v51 = vadd.f32 %v573_v50, %v572_v49 }
 0x417   :  { %v575_v30 = vrot.slane %v574_v51, 2 }
 0x419   :  { %v576_v59 = vadd.f32 %v575_v30, %v574_v51 }
 0x41b   :  { %v577_v54 = vrot.slane %v576_v59, 1 }
 0x41d   :  { %v578_v58 = vadd.f32 %v577_v54, %v576_v59 }
 0x41f   :  { %757 = vrcp.f32 %v578_v58  ;;  %v590_v39 = vand.u32 2147483648, %v578_v58  ;;  %v588_v33 = vand.u32 2147483647, %v578_v58  ;;  %vm584_vm10 = vweird.f32 %v578_v58 }
 0x421   :  { %v591_v4 = vor.u32 1.1754944e-38, %v590_v39  ;;  %vm589_vm7 = vcmp.eq.f32.partialorder %v588_v33, 8.507059e+37 }
 0x425   :  { %v758_v61 = vpop.eup %757 }
 0x426   :  { %v580_v56 = vmul.f32 %v758_v61, %v578_v58  ;;  %vm585_vm4 = vweird.f32 %v758_v61 }
 0x427   :  { %vm586_vm6 = vmor %vm584_vm10, %vm585_vm4 }
 0x428   :  { %v581_v19 = vsub.f32 1.0, %v580_v56 }
 0x42a   :  { %v582_v22 = vmul.f32 %v758_v61, %v581_v19 }
 0x42c   :  { %v583_v18 = vadd.f32 %v758_v61, %v582_v22 }
 0x42e   :  { %v587_v0 = vsel %vm586_vm6, %v758_v61, %v583_v18 }
 0x42f   :  { %v592_v10 = vsel %vm589_vm7, %v591_v4, %v587_v0 }
 0x430   :  { %v593_v62 = vmul.f32 0.0078125, %v592_v10 }
 0x432   :  { %v595_v8 = vmul.f32 %v593_v62, %v571_v44  ;;  %v594_v15 = vmul.f32 %v593_v62, %v570_v48 }
 0x434   :  { %598 = vadd.xlane.f32.xlu2 %v595_v8  ;;  %596 = vadd.xlane.f32.xlu1 %v594_v15 }
 0x4a7   :  { %v599_v25 = vpop.xlane.xlu2 %598  ;;  %v597_v16 = vpop.xlane.xlu1 %596 }
 0x4a8   :  { %759 = vrcp.f32 %v599_v25  ;;  %v626_v26 = vand.u32 2147483648, %v599_v25  ;;  %v624_v1 = vand.u32 2147483647, %v599_v25  ;;  %v611_v17 = vand.u32 2147483648, %v597_v16 }
 0x4a9   :  { %761 = vrcp.f32 %v597_v16  ;;  %v609_v24 = vand.u32 2147483647, %v597_v16  ;;  %vm620_vm11 = vweird.f32 %v599_v25  ;;  %vm605_vm0 = vweird.f32 %v597_v16 }
 0x4aa   :  { %v627_v46 = vor.u32 1.1754944e-38, %v626_v26  ;;  %vm625_vm13 = vcmp.eq.f32.partialorder %v624_v1, 8.507059e+37  ;;  %v612_v21 = vor.u32 1.1754944e-38, %v611_v17 }
 0x4ab   :  { %vm610_vm15 = vcmp.eq.f32.partialorder %v609_v24, 8.507059e+37 }
 0x4ae   :  { %v760_v42 = vpop.eup %759 }
 0x4af   :  { %v762_v20 = vpop.eup %761  ;;  %v616_v63 = vmul.f32 %v760_v42, %v599_v25  ;;  %vm621_vm8 = vweird.f32 %v760_v42 }
 0x4b0   :  { %v601_v14 = vmul.f32 %v762_v20, %v597_v16  ;;  %vm606_vm5 = vweird.f32 %v762_v20  ;;  %vm622_vm12 = vmor %vm620_vm11, %vm621_vm8 }
 0x4b1   :  { %v617_v2 = vsub.f32 1.0, %v616_v63  ;;  %vm607_vm14 = vmor %vm605_vm0, %vm606_vm5 }
 0x4b2   :  { %v602_v43 = vsub.f32 1.0, %v601_v14 }
 0x4b3   :  { %v618_v11 = vmul.f32 %v760_v42, %v617_v2 }
 0x4b4   :  { %v603_v52 = vmul.f32 %v762_v20, %v602_v43 }
 0x4b5   :  { %v619_v55 = vadd.f32 %v760_v42, %v618_v11 }
 0x4b6   :  { %v604_v47 = vadd.f32 %v762_v20, %v603_v52 }
 0x4b7   :  { %v623_v53 = vsel %vm622_vm12, %v760_v42, %v619_v55 }
 0x4b8   :  { %v608_v27 = vsel %vm607_vm14, %v762_v20, %v604_v47  ;;  %v628_v23 = vsel %vm625_vm13, %v627_v46, %v623_v53 }
 0x4b9   :  { %v613_v31 = vsel %vm610_vm15, %v612_v21, %v608_v27  ;;  %v629_v32 = vmul.f32 0.0625, %v628_v23 }
 0x4ba   :  { %v614_v45 = vmul.f32 0.0625, %v613_v31 }
 0x4bb   :  { %v631_v28 = vmul.f32 %v629_v32, %v595_v8 }
 0x4bc   :  { %v630_v12 = vmul.f32 %v614_v45, %v594_v15 }
 0x4be   :  { %v632_v29 = vadd.f32 %v631_v28, %v630_v12 }
 0x4c0   :  { %v633_v9 = vrot.slane %v632_v29, 4 }
 0x4c2   :  { %v634_v34 = vadd.f32 %v633_v9, %v632_v29 }
 0x4c4   :  { %v635_v57 = vrot.slane %v634_v34, 2 }
 0x4c6   :  { %v636_v6 = vadd.f32 %v635_v57, %v634_v34 }
 0x4c8   :  { %v637_v5 = vrot.slane %v636_v6, 1 }
 0x4ca   :  { %v638_v36 = vadd.f32 %v637_v5, %v636_v6 }
 0x4cc   :  { %763 = vrcp.f32 %v638_v36  ;;  %v650_v40 = vand.u32 2147483648, %v638_v36  ;;  %v648_v7 = vand.u32 2147483647, %v638_v36  ;;  %vm644_vm2 = vweird.f32 %v638_v36 }
 0x4ce   :  { %v651_v3 = vor.u32 1.1754944e-38, %v650_v40  ;;  %vm649_vm9 = vcmp.eq.f32.partialorder %v648_v7, 8.507059e+37 }
 0x4d2   :  { %v764_v37 = vpop.eup %763 }
 0x4d3   :  { %v640_v35 = vmul.f32 %v764_v37, %v638_v36  ;;  %vm645_vm1 = vweird.f32 %v764_v37 }
 0x4d4   :  { %vm646_vm3 = vmor %vm644_vm2, %vm645_vm1 }
 0x4d5   :  { %v641_v13 = vsub.f32 1.0, %v640_v35 }
 0x4d7   :  { %v642_v41 = vmul.f32 %v764_v37, %v641_v13 }
 0x4d9   :  { %v643_v60 = vadd.f32 %v764_v37, %v642_v41 }
 0x4db   :  { %v647_v38 = vsel %vm646_vm3, %v764_v37, %v643_v60 }
 0x4dc   :  { %v652_v44 = vsel %vm649_vm9, %v651_v3, %v647_v38 }
 0x4dd   :  { %v653_v48 = vmul.f32 0.0078125, %v652_v44 }
 0x4df   :  { %v655_v49 = vmul.f32 %v653_v48, %v631_v28  ;;  %v654_v50 = vmul.f32 %v653_v48, %v630_v12 }
 0x4e1   :  { %658 = vadd.xlane.f32.xlu1 %v655_v49  ;;  %656 = vadd.xlane.f32.xlu0 %v654_v50 }
 0x554   :  { %v659_v51 = vpop.xlane.xlu1 %658  ;;  %v657_v30 = vpop.xlane.xlu0 %656 }
 0x555   :  { %765 = vrcp.f32 %v659_v51  ;;  %v686_v19 = vand.u32 2147483648, %v659_v51  ;;  %v684_v33 = vand.u32 2147483647, %v659_v51  ;;  %v671_v18 = vand.u32 2147483648, %v657_v30 }
 0x556   :  { %767 = vrcp.f32 %v657_v30  ;;  %v669_v0 = vand.u32 2147483647, %v657_v30  ;;  %vm680_vm6 = vweird.f32 %v659_v51  ;;  %vm665_vm8 = vweird.f32 %v657_v30 }
 0x557   :  { %v687_v62 = vor.u32 1.1754944e-38, %v686_v19  ;;  %vm685_vm5 = vcmp.eq.f32.partialorder %v684_v33, 8.507059e+37  ;;  %v672_v25 = vor.u32 1.1754944e-38, %v671_v18 }
 0x558   :  { %vm670_vm12 = vcmp.eq.f32.partialorder %v669_v0, 8.507059e+37 }
 0x55b   :  { %v766_v59 = vpop.eup %765 }
 0x55c   :  { %v768_v54 = vpop.eup %767  ;;  %v676_v58 = vmul.f32 %v766_v59, %v659_v51  ;;  %vm681_vm4 = vweird.f32 %v766_v59 }
 0x55d   :  { %v661_v61 = vmul.f32 %v768_v54, %v657_v30  ;;  %vm666_vm10 = vweird.f32 %v768_v54  ;;  %vm682_vm7 = vmor %vm680_vm6, %vm681_vm4 }
 0x55e   :  { %v677_v56 = vsub.f32 1.0, %v676_v58  ;;  %vm667_vm11 = vmor %vm665_vm8, %vm666_vm10 }
 0x55f   :  { %v662_v39 = vsub.f32 1.0, %v661_v61 }
 0x560   :  { %v678_v22 = vmul.f32 %v766_v59, %v677_v56 }
 0x561   :  { %v663_v4 = vmul.f32 %v768_v54, %v662_v39 }
 0x562   :  { %v679_v10 = vadd.f32 %v766_v59, %v678_v22 }
 0x563   :  { %v664_v8 = vadd.f32 %v768_v54, %v663_v4 }
 0x564   :  { %v683_v15 = vsel %vm682_vm7, %v766_v59, %v679_v10 }
 0x565   :  { %v688_v16 = vsel %vm685_vm5, %v687_v62, %v683_v15  ;;  %v668_v42 = vsel %vm667_vm11, %v768_v54, %v664_v8 }
 0x566   :  { %v689_v20 = vmul.f32 %v688_v16, %v655_v49  ;;  %v673_v63 = vsel %vm670_vm12, %v672_v25, %v668_v42 }
 0x567   :  { %v674_v14 = vmul.f32 %v673_v63, %v654_v50 }
 0x568   :  { %691 = vst [vmem:[%s1370_s2 + $0x8] sm:$0xff] %v689_v20 }
 0x569   :  { %690 = vst [vmem:[%s1370_s2] sm:$0xff] %v674_v14 }

</bundles_post_ra>
